<compile_context>
chip_gen: v5e
topology: v5e:2x2
jax: 0.10.0
libtpu: 0.0.40
codegen_flags: <defaults>
</compile_context>

<pallas_src>
import functools

import jax
import jax.numpy as jnp
from jax.experimental import pallas as pl
from jax.experimental.pallas import tpu as pltpu


def _round_up(x, mult):
    return ((x + mult - 1) // mult) * mult


def _vmem_limit_bytes():
    """Generation-aware scoped-VMEM limit: ~3/4 of physical, capped at 100 MiB."""
    cap = 64 * 1024 * 1024  # conservative default == v7x physical VMEM per core
    try:
        cap = int(getattr(pltpu.get_tpu_info(), "vmem_capacity_bytes", cap))
    except Exception:
        pass
    return int(min(cap * 3 // 4, 100 * 1024 * 1024))


def _pick_tile_h(n, h_out, w_out, max_rows):
    """Pick TH | h_out so TH*Wout is lane-dense (mult of 128, else 8) and the
    (n, h-blocks) grid has >= 4 parallel steps when possible (megacore)."""
    divisors = [d for d in range(1, h_out + 1) if h_out % d == 0]
    cands = []
    for mult in (128, 8):
        cands = [d for d in divisors
                 if (d * w_out) % mult == 0 and d * w_out <= max_rows]
        if cands:
            break
    if not cands:
        cands = [d for d in divisors if d * w_out <= max_rows] or [1]
    preferred = [d for d in cands if n * (h_out // d) >= 4]
    if preferred:
        cands = preferred
    return max(cands)


# ----------------------------- Pallas kernels ------------------------------

def _conv_stats_kernel(kh, kw, th, w_out,
                       x_ref, w_ref, o_ref, psum_ref, psq_ref):
    """Implicit-im2col conv for one (image, output-row-block) grid step.

    x_ref : (1, Hp, Wp, Cin)      bf16  whole padded image (resident per n)
    w_ref : (Kh*Kw, Cin, Cout_p)  bf16  whole weight (resident for the run)
    o_ref : (TH*Wout, Cout_p)     bf16  conv rows of this block
    psum/psq : (8, Cout_p)        f32   per-block channel sum / sum-of-squares
    """
    hi = pl.program_id(1)
    h0 = hi * th                      # first output row of this block (stride 1)
    acc = None
    for i in range(kh):
        for j in range(kw):
            patch = x_ref[0, pl.ds(h0 + i, th), pl.ds(j, w_out), :]
            a2 = patch.reshape(th * w_out, patch.shape[-1])
            prod = jnp.dot(a2, w_ref[i * kw + j],
                           preferred_element_type=jnp.float32)
            acc = prod if acc is None else acc + prod
    o_ref[...] = acc.astype(o_ref.dtype)
    # Fused BatchNorm batch statistics from the f32 accumulator.
    s = jnp.sum(acc, axis=0, keepdims=True)            # (1, Cout_p)
    sq = jnp.sum(acc * acc, axis=0, keepdims=True)     # (1, Cout_p)
    psum_ref[...] = jnp.broadcast_to(s, psum_ref.shape)
    psq_ref[...] = jnp.broadcast_to(sq, psq_ref.shape)


def _bn_relu_nchw_kernel(cout, x_ref, scale_ref, shift_ref, o_ref):
    """Folded BatchNorm + ReLU on one row block, written directly in NCHW
    layout (the NHWC->NCHW transpose is folded into this epilogue)."""
    y = x_ref[...].astype(jnp.float32) * scale_ref[...] + shift_ref[...]
    y = jnp.maximum(y, 0.0)                 # (rows, Cout_p)
    yt = jnp.transpose(y, (1, 0))           # (Cout_p, rows), lane-dense rows
    o_ref[0] = yt[:cout, :]


# ------------------------------- Wrapper -----------------------------------

def conv_bn_relu(x_nchw, weight, bias, gamma, beta, *, stride=1, padding=0,
                 eps=1e-5):
    """Conv2d -> BatchNorm2d (training-mode stats) -> ReLU, NCHW in/out."""
    n, cin, h, w = x_nchw.shape
    cout, cin_w, kh, kw = weight.shape
    assert cin == cin_w
    if stride != 1:
        # TODO(synk): strided implicit-im2col path (strided H/W window slices
        # inside the kernel); only stride == 1 is implemented here.
        raise NotImplementedError("this Pallas kernel implements stride == 1")
    del bias  # cancelled exactly by training-mode BatchNorm mean subtraction

    hp, wp = h + 2 * padding, w + 2 * padding
    h_out = hp - kh + 1
    w_out = wp - kw + 1

    cout_pad = _round_up(cout, 128)
    vmem_limit = _vmem_limit_bytes()
    max_rows = max(8, min(1024, vmem_limit // (cout_pad * 16)))
    th = _pick_tile_h(n, h_out, w_out, max_rows)
    rows = th * w_out
    n_hblocks = h_out // th
    n_steps = n * n_hblocks
    m = n * h_out * w_out
    # Fail loudly on bad tilings instead of producing misaligned blocks.
    assert rows % 8 == 0 or (n == 1 and th == h_out), (th, w_out)
    assert rows % 128 == 0 or th == h_out, (th, w_out)
    # TODO(synk): tile the H window (overlapping manual DMA) instead of keeping
    # the whole padded image resident when Hp*Wp*Cin no longer fits in VMEM.

    # Input: NCHW -> NHWC, spatial zero-pad, bf16 (one cheap input-sized pass).
    x_nhwc = jnp.transpose(x_nchw, (0, 2, 3, 1)).astype(jnp.bfloat16)
    x_pad = jnp.pad(
        x_nhwc, ((0, 0), (padding, padding), (padding, padding), (0, 0)))

    # Weight: (Cout, Cin, Kh, Kw) -> (Kh*Kw, Cin, Cout_pad) bf16, lane-dense.
    w_mat = jnp.transpose(weight, (2, 3, 1, 0)).reshape(kh * kw, cin, cout)
    w_mat = jnp.pad(w_mat, ((0, 0), (0, 0), (0, cout_pad - cout))
                    ).astype(jnp.bfloat16)

    # --- kernel 1: implicit-im2col conv + fused BN statistics ----------------
    conv_out, psum, psq = pl.pallas_call(
        functools.partial(_conv_stats_kernel, kh, kw, th, w_out),
        out_shape=(
            jax.ShapeDtypeStruct((m, cout_pad), jnp.bfloat16),
            jax.ShapeDtypeStruct((n_steps * 8, cout_pad), jnp.float32),
            jax.ShapeDtypeStruct((n_steps * 8, cout_pad), jnp.float32),
        ),
        grid_spec=pltpu.PrefetchScalarGridSpec(
            num_scalar_prefetch=0,
            grid=(n, n_hblocks),
            in_specs=[
                # Whole padded image; constant across the h-block axis so it is
                # DMA'd once per image and stays resident in VMEM.
                pl.BlockSpec((1, hp, wp, cin), lambda ni, hi: (ni, 0, 0, 0)),
                # Whole weight; constant index -> DMA'd once, never re-fetched.
                pl.BlockSpec((kh * kw, cin, cout_pad),
                             lambda ni, hi: (0, 0, 0)),
            ],
            out_specs=(
                pl.BlockSpec((rows, cout_pad),
                             lambda ni, hi: (ni * n_hblocks + hi, 0)),
                pl.BlockSpec((8, cout_pad),
                             lambda ni, hi: (ni * n_hblocks + hi, 0)),
                pl.BlockSpec((8, cout_pad),
                             lambda ni, hi: (ni * n_hblocks + hi, 0)),
            ),
        ),
        compiler_params=pltpu.CompilerParams(
            dimension_semantics=("parallel", "parallel"),
            vmem_limit_bytes=vmem_limit),
    )(x_pad, w_mat)

    # --- finalize BatchNorm batch statistics (tiny, per-channel, once) -------
    # Every block holds exactly rows real outputs (no padded M rows); padded
    # Cout columns are all-zero, so dividing by the true M is exact.
    ch_sum = psum.reshape(n_steps, 8, cout_pad)[:, 0, :].sum(axis=0)
    ch_sq = psq.reshape(n_steps, 8, cout_pad)[:, 0, :].sum(axis=0)
    mean = ch_sum / m
    # TODO(synk): compensated / centered variance for very large M or channels
    # with mean >> std (E[x^2]-mean^2 can cancel in f32).
    var = jnp.maximum(ch_sq / m - mean * mean, 0.0)   # biased (training) var
    gamma_pad = jnp.pad(gamma.astype(jnp.float32), (0, cout_pad - cout),
                        constant_values=1.0)
    beta_pad = jnp.pad(beta.astype(jnp.float32), (0, cout_pad - cout))
    inv = jax.lax.rsqrt(var + eps)
    scale = (gamma_pad * inv).reshape(1, cout_pad)
    shift = (beta_pad - mean * gamma_pad * inv).reshape(1, cout_pad)

    # --- kernel 2: normalize + ReLU, NCHW writeback (transpose folded in) ----
    out_flat = pl.pallas_call(
        functools.partial(_bn_relu_nchw_kernel, cout),
        out_shape=jax.ShapeDtypeStruct((n, cout, h_out * w_out), jnp.float32),
        grid_spec=pltpu.PrefetchScalarGridSpec(
            num_scalar_prefetch=0,
            grid=(n, n_hblocks),
            in_specs=[
                pl.BlockSpec((rows, cout_pad),
                             lambda ni, hi: (ni * n_hblocks + hi, 0)),
                pl.BlockSpec((1, cout_pad), lambda ni, hi: (0, 0)),
                pl.BlockSpec((1, cout_pad), lambda ni, hi: (0, 0)),
            ],
            out_specs=pl.BlockSpec((1, cout, rows),
                                   lambda ni, hi: (ni, 0, hi)),
        ),
        compiler_params=pltpu.CompilerParams(
            dimension_semantics=("parallel", "parallel"),
            vmem_limit_bytes=vmem_limit),
    )(conv_out, scale, shift)

    return out_flat.reshape(n, cout, h_out, w_out)  # free reshape, already NCHW


# ------------------------------ Reference -----------------------------------

def _reference(x_nchw, weight, bias, gamma, beta, stride, padding, eps=1e-5):
    conv = jax.lax.conv_general_dilated(
        x_nchw, weight, window_strides=(stride, stride),
        padding=[(padding, padding), (padding, padding)],
        dimension_numbers=("NCHW", "OIHW", "NCHW"))
    conv = conv + bias.reshape(1, -1, 1, 1)
    mean = conv.mean(axis=(0, 2, 3), keepdims=True)
    var = ((conv - mean) ** 2).mean(axis=(0, 2, 3), keepdims=True)
    y = ((conv - mean) * jax.lax.rsqrt(var + eps)
         * gamma.reshape(1, -1, 1, 1) + beta.reshape(1, -1, 1, 1))
    return jnp.maximum(y, 0.0)


# --------------------------------- Main --------------------------------------

if __name__ == "__main__":
    # Small shapes consistent with the module's forward.
    N, Cin, H, W = 2, 4, 16, 16
    Cout, Ksz, stride, padding = 8, 3, 1, 1

    key = jax.random.PRNGKey(0)
    kx, kwt, kb = jax.random.split(key, 3)

    x = jax.random.normal(kx, (N, Cin, H, W), dtype=jnp.float32)

    # Deterministic parameter init (PyTorch-style kaiming-uniform bounds).
    fan_in = Cin * Ksz * Ksz
    bound = 1.0 / (fan_in ** 0.5)
    conv_weight = jax.random.uniform(
        kwt, (Cout, Cin, Ksz, Ksz), minval=-bound, maxval=bound,
        dtype=jnp.float32)
    conv_bias = jax.random.uniform(
        kb, (Cout,), minval=-bound, maxval=bound, dtype=jnp.float32)
    bn_gamma = jnp.ones((Cout,), jnp.float32)   # nn.BatchNorm2d default init
    bn_beta = jnp.zeros((Cout,), jnp.float32)

    out = conv_bn_relu(x, conv_weight, conv_bias, bn_gamma, bn_beta,
                       stride=stride, padding=padding)
    out = jax.block_until_ready(out)

    assert out.shape == (N, Cout, H, W), out.shape
    assert bool(jnp.all(out >= 0.0))  # ReLU sanity

    ref = _reference(x, conv_weight, conv_bias, bn_gamma, bn_beta,
                     stride, padding)
    max_err = float(jnp.max(jnp.abs(out - ref)))
    # bf16 MXU inputs + bf16 conv intermediate, f32 accumulation/statistics.
    assert max_err < 1e-1, max_err

    print("KERNEL_OK")
</pallas_src>

<mosaic_0001>
module attributes {stable_mosaic.version = 11 : i64} {
  func.func @_conv_stats_kernel(%arg0: i32, %arg1: i32, %arg2: memref<1x18x18x4xbf16, #tpu.memory_space<vmem>>, %arg3: memref<9x4x128xbf16, #tpu.memory_space<vmem>>, %arg4: memref<128x128xbf16, #tpu.memory_space<vmem>>, %arg5: memref<8x128xf32, #tpu.memory_space<vmem>>, %arg6: memref<8x128xf32, #tpu.memory_space<vmem>>) attributes {dimension_semantics = [#tpu.dimension_semantics<parallel>, #tpu.dimension_semantics<parallel>], iteration_bounds = array<i64: 2, 2>, scalar_prefetch = 0 : i64, scratch_operands = 0 : i64, tpu.core_type = #tpu.core_type<tc>, window_params = [{transform_indices = @transform_0, window_bounds = array<i64: 1, 18, 18, 4>}, {pipeline_mode = #tpu.pipeline_mode<synchronous>, transform_indices = @transform_1, window_bounds = array<i64: 9, 4, 128>}, {transform_indices = @transform_2, window_bounds = array<i64: 128, 128>}, {transform_indices = @transform_3, window_bounds = array<i64: 8, 128>}, {transform_indices = @transform_4, window_bounds = array<i64: 8, 128>}]} {
    %c8_i32 = arith.constant 8 : i32
    %0 = arith.muli %arg1, %c8_i32 : i32
    %c0_i32 = arith.constant 0 : i32
    %1 = arith.addi %0, %c0_i32 : i32
    %c0 = arith.constant 0 : index
    %2 = arith.index_cast %1 : i32 to index
    %c0_0 = arith.constant 0 : index
    %c0_1 = arith.constant 0 : index
    %3 = vector.load %arg2[%c0, %2, %c0_0, %c0_1] : memref<1x18x18x4xbf16, #tpu.memory_space<vmem>>, vector<1x8x16x4xbf16>
    %4 = vector.shape_cast %3 : vector<1x8x16x4xbf16> to vector<8x16x4xbf16>
    %5 = vector.shape_cast %4 : vector<8x16x4xbf16> to vector<128x4xbf16>
    %c0_2 = arith.constant 0 : index
    %c0_3 = arith.constant 0 : index
    %c0_4 = arith.constant 0 : index
    %6 = vector.load %arg3[%c0_2, %c0_3, %c0_4] : memref<9x4x128xbf16, #tpu.memory_space<vmem>>, vector<1x4x128xbf16>
    %7 = vector.shape_cast %6 : vector<1x4x128xbf16> to vector<4x128xbf16>
    %cst = arith.constant dense<0.000000e+00> : vector<128x128xf32>
    %8 = tpu.matmul %5, %7, %cst {dimension_numbers = #tpu.dot_dimension_numbers<[1], [0], [0], [1], [0, 0, 1, 1], [], []>} : vector<128x4xbf16>, vector<4x128xbf16>, vector<128x128xf32> -> vector<128x128xf32>
    %c0_i32_5 = arith.constant 0 : i32
    %9 = arith.addi %0, %c0_i32_5 : i32
    %c0_6 = arith.constant 0 : index
    %10 = arith.index_cast %9 : i32 to index
    %c1 = arith.constant 1 : index
    %c0_7 = arith.constant 0 : index
    %11 = vector.load %arg2[%c0_6, %10, %c1, %c0_7] : memref<1x18x18x4xbf16, #tpu.memory_space<vmem>>, vector<1x8x16x4xbf16>
    %12 = vector.shape_cast %11 : vector<1x8x16x4xbf16> to vector<8x16x4xbf16>
    %13 = vector.shape_cast %12 : vector<8x16x4xbf16> to vector<128x4xbf16>
    %c1_8 = arith.constant 1 : index
    %c0_9 = arith.constant 0 : index
    %c0_10 = arith.constant 0 : index
    %14 = vector.load %arg3[%c1_8, %c0_9, %c0_10] : memref<9x4x128xbf16, #tpu.memory_space<vmem>>, vector<1x4x128xbf16>
    %15 = vector.shape_cast %14 : vector<1x4x128xbf16> to vector<4x128xbf16>
    %cst_11 = arith.constant dense<0.000000e+00> : vector<128x128xf32>
    %16 = tpu.matmul %13, %15, %cst_11 {dimension_numbers = #tpu.dot_dimension_numbers<[1], [0], [0], [1], [0, 0, 1, 1], [], []>} : vector<128x4xbf16>, vector<4x128xbf16>, vector<128x128xf32> -> vector<128x128xf32>
    %17 = arith.addf %8, %16 : vector<128x128xf32>
    %c0_i32_12 = arith.constant 0 : i32
    %18 = arith.addi %0, %c0_i32_12 : i32
    %c0_13 = arith.constant 0 : index
    %19 = arith.index_cast %18 : i32 to index
    %c2 = arith.constant 2 : index
    %c0_14 = arith.constant 0 : index
    %20 = vector.load %arg2[%c0_13, %19, %c2, %c0_14] : memref<1x18x18x4xbf16, #tpu.memory_space<vmem>>, vector<1x8x16x4xbf16>
    %21 = vector.shape_cast %20 : vector<1x8x16x4xbf16> to vector<8x16x4xbf16>
    %22 = vector.shape_cast %21 : vector<8x16x4xbf16> to vector<128x4xbf16>
    %c2_15 = arith.constant 2 : index
    %c0_16 = arith.constant 0 : index
    %c0_17 = arith.constant 0 : index
    %23 = vector.load %arg3[%c2_15, %c0_16, %c0_17] : memref<9x4x128xbf16, #tpu.memory_space<vmem>>, vector<1x4x128xbf16>
    %24 = vector.shape_cast %23 : vector<1x4x128xbf16> to vector<4x128xbf16>
    %cst_18 = arith.constant dense<0.000000e+00> : vector<128x128xf32>
    %25 = tpu.matmul %22, %24, %cst_18 {dimension_numbers = #tpu.dot_dimension_numbers<[1], [0], [0], [1], [0, 0, 1, 1], [], []>} : vector<128x4xbf16>, vector<4x128xbf16>, vector<128x128xf32> -> vector<128x128xf32>
    %26 = arith.addf %17, %25 : vector<128x128xf32>
    %c1_i32 = arith.constant 1 : i32
    %27 = arith.addi %0, %c1_i32 : i32
    %c0_19 = arith.constant 0 : index
    %28 = arith.index_cast %27 : i32 to index
    %c0_20 = arith.constant 0 : index
    %c0_21 = arith.constant 0 : index
    %29 = vector.load %arg2[%c0_19, %28, %c0_20, %c0_21] : memref<1x18x18x4xbf16, #tpu.memory_space<vmem>>, vector<1x8x16x4xbf16>
    %30 = vector.shape_cast %29 : vector<1x8x16x4xbf16> to vector<8x16x4xbf16>
    %31 = vector.shape_cast %30 : vector<8x16x4xbf16> to vector<128x4xbf16>
    %c3 = arith.constant 3 : index
    %c0_22 = arith.constant 0 : index
    %c0_23 = arith.constant 0 : index
    %32 = vector.load %arg3[%c3, %c0_22, %c0_23] : memref<9x4x128xbf16, #tpu.memory_space<vmem>>, vector<1x4x128xbf16>
    %33 = vector.shape_cast %32 : vector<1x4x128xbf16> to vector<4x128xbf16>
    %cst_24 = arith.constant dense<0.000000e+00> : vector<128x128xf32>
    %34 = tpu.matmul %31, %33, %cst_24 {dimension_numbers = #tpu.dot_dimension_numbers<[1], [0], [0], [1], [0, 0, 1, 1], [], []>} : vector<128x4xbf16>, vector<4x128xbf16>, vector<128x128xf32> -> vector<128x128xf32>
    %35 = arith.addf %26, %34 : vector<128x128xf32>
    %c1_i32_25 = arith.constant 1 : i32
    %36 = arith.addi %0, %c1_i32_25 : i32
    %c0_26 = arith.constant 0 : index
    %37 = arith.index_cast %36 : i32 to index
    %c1_27 = arith.constant 1 : index
    %c0_28 = arith.constant 0 : index
    %38 = vector.load %arg2[%c0_26, %37, %c1_27, %c0_28] : memref<1x18x18x4xbf16, #tpu.memory_space<vmem>>, vector<1x8x16x4xbf16>
    %39 = vector.shape_cast %38 : vector<1x8x16x4xbf16> to vector<8x16x4xbf16>
    %40 = vector.shape_cast %39 : vector<8x16x4xbf16> to vector<128x4xbf16>
    %c4 = arith.constant 4 : index
    %c0_29 = arith.constant 0 : index
    %c0_30 = arith.constant 0 : index
    %41 = vector.load %arg3[%c4, %c0_29, %c0_30] : memref<9x4x128xbf16, #tpu.memory_space<vmem>>, vector<1x4x128xbf16>
    %42 = vector.shape_cast %41 : vector<1x4x128xbf16> to vector<4x128xbf16>
    %cst_31 = arith.constant dense<0.000000e+00> : vector<128x128xf32>
    %43 = tpu.matmul %40, %42, %cst_31 {dimension_numbers = #tpu.dot_dimension_numbers<[1], [0], [0], [1], [0, 0, 1, 1], [], []>} : vector<128x4xbf16>, vector<4x128xbf16>, vector<128x128xf32> -> vector<128x128xf32>
    %44 = arith.addf %35, %43 : vector<128x128xf32>
    %c1_i32_32 = arith.constant 1 : i32
    %45 = arith.addi %0, %c1_i32_32 : i32
    %c0_33 = arith.constant 0 : index
    %46 = arith.index_cast %45 : i32 to index
    %c2_34 = arith.constant 2 : index
    %c0_35 = arith.constant 0 : index
    %47 = vector.load %arg2[%c0_33, %46, %c2_34, %c0_35] : memref<1x18x18x4xbf16, #tpu.memory_space<vmem>>, vector<1x8x16x4xbf16>
    %48 = vector.shape_cast %47 : vector<1x8x16x4xbf16> to vector<8x16x4xbf16>
    %49 = vector.shape_cast %48 : vector<8x16x4xbf16> to vector<128x4xbf16>
    %c5 = arith.constant 5 : index
    %c0_36 = arith.constant 0 : index
    %c0_37 = arith.constant 0 : index
    %50 = vector.load %arg3[%c5, %c0_36, %c0_37] : memref<9x4x128xbf16, #tpu.memory_space<vmem>>, vector<1x4x128xbf16>
    %51 = vector.shape_cast %50 : vector<1x4x128xbf16> to vector<4x128xbf16>
    %cst_38 = arith.constant dense<0.000000e+00> : vector<128x128xf32>
    %52 = tpu.matmul %49, %51, %cst_38 {dimension_numbers = #tpu.dot_dimension_numbers<[1], [0], [0], [1], [0, 0, 1, 1], [], []>} : vector<128x4xbf16>, vector<4x128xbf16>, vector<128x128xf32> -> vector<128x128xf32>
    %53 = arith.addf %44, %52 : vector<128x128xf32>
    %c2_i32 = arith.constant 2 : i32
    %54 = arith.addi %0, %c2_i32 : i32
    %c0_39 = arith.constant 0 : index
    %55 = arith.index_cast %54 : i32 to index
    %c0_40 = arith.constant 0 : index
    %c0_41 = arith.constant 0 : index
    %56 = vector.load %arg2[%c0_39, %55, %c0_40, %c0_41] : memref<1x18x18x4xbf16, #tpu.memory_space<vmem>>, vector<1x8x16x4xbf16>
    %57 = vector.shape_cast %56 : vector<1x8x16x4xbf16> to vector<8x16x4xbf16>
    %58 = vector.shape_cast %57 : vector<8x16x4xbf16> to vector<128x4xbf16>
    %c6 = arith.constant 6 : index
    %c0_42 = arith.constant 0 : index
    %c0_43 = arith.constant 0 : index
    %59 = vector.load %arg3[%c6, %c0_42, %c0_43] : memref<9x4x128xbf16, #tpu.memory_space<vmem>>, vector<1x4x128xbf16>
    %60 = vector.shape_cast %59 : vector<1x4x128xbf16> to vector<4x128xbf16>
    %cst_44 = arith.constant dense<0.000000e+00> : vector<128x128xf32>
    %61 = tpu.matmul %58, %60, %cst_44 {dimension_numbers = #tpu.dot_dimension_numbers<[1], [0], [0], [1], [0, 0, 1, 1], [], []>} : vector<128x4xbf16>, vector<4x128xbf16>, vector<128x128xf32> -> vector<128x128xf32>
    %62 = arith.addf %53, %61 : vector<128x128xf32>
    %c2_i32_45 = arith.constant 2 : i32
    %63 = arith.addi %0, %c2_i32_45 : i32
    %c0_46 = arith.constant 0 : index
    %64 = arith.index_cast %63 : i32 to index
    %c1_47 = arith.constant 1 : index
    %c0_48 = arith.constant 0 : index
    %65 = vector.load %arg2[%c0_46, %64, %c1_47, %c0_48] : memref<1x18x18x4xbf16, #tpu.memory_space<vmem>>, vector<1x8x16x4xbf16>
    %66 = vector.shape_cast %65 : vector<1x8x16x4xbf16> to vector<8x16x4xbf16>
    %67 = vector.shape_cast %66 : vector<8x16x4xbf16> to vector<128x4xbf16>
    %c7 = arith.constant 7 : index
    %c0_49 = arith.constant 0 : index
    %c0_50 = arith.constant 0 : index
    %68 = vector.load %arg3[%c7, %c0_49, %c0_50] : memref<9x4x128xbf16, #tpu.memory_space<vmem>>, vector<1x4x128xbf16>
    %69 = vector.shape_cast %68 : vector<1x4x128xbf16> to vector<4x128xbf16>
    %cst_51 = arith.constant dense<0.000000e+00> : vector<128x128xf32>
    %70 = tpu.matmul %67, %69, %cst_51 {dimension_numbers = #tpu.dot_dimension_numbers<[1], [0], [0], [1], [0, 0, 1, 1], [], []>} : vector<128x4xbf16>, vector<4x128xbf16>, vector<128x128xf32> -> vector<128x128xf32>
    %71 = arith.addf %62, %70 : vector<128x128xf32>
    %c2_i32_52 = arith.constant 2 : i32
    %72 = arith.addi %0, %c2_i32_52 : i32
    %c0_53 = arith.constant 0 : index
    %73 = arith.index_cast %72 : i32 to index
    %c2_54 = arith.constant 2 : index
    %c0_55 = arith.constant 0 : index
    %74 = vector.load %arg2[%c0_53, %73, %c2_54, %c0_55] : memref<1x18x18x4xbf16, #tpu.memory_space<vmem>>, vector<1x8x16x4xbf16>
    %75 = vector.shape_cast %74 : vector<1x8x16x4xbf16> to vector<8x16x4xbf16>
    %76 = vector.shape_cast %75 : vector<8x16x4xbf16> to vector<128x4xbf16>
    %c8 = arith.constant 8 : index
    %c0_56 = arith.constant 0 : index
    %c0_57 = arith.constant 0 : index
    %77 = vector.load %arg3[%c8, %c0_56, %c0_57] : memref<9x4x128xbf16, #tpu.memory_space<vmem>>, vector<1x4x128xbf16>
    %78 = vector.shape_cast %77 : vector<1x4x128xbf16> to vector<4x128xbf16>
    %cst_58 = arith.constant dense<0.000000e+00> : vector<128x128xf32>
    %79 = tpu.matmul %76, %78, %cst_58 {dimension_numbers = #tpu.dot_dimension_numbers<[1], [0], [0], [1], [0, 0, 1, 1], [], []>} : vector<128x4xbf16>, vector<4x128xbf16>, vector<128x128xf32> -> vector<128x128xf32>
    %80 = arith.addf %71, %79 : vector<128x128xf32>
    %81 = arith.truncf %80 : vector<128x128xf32> to vector<128x128xbf16>
    %c0_59 = arith.constant 0 : index
    %c0_60 = arith.constant 0 : index
    %82 = vector.load %arg4[%c0_59, %c0_60] : memref<128x128xbf16, #tpu.memory_space<vmem>>, vector<128x128xbf16>
    tpu.vector_store %arg4[%c0_59, %c0_60], %81 {strides = array<i32>} : memref<128x128xbf16, #tpu.memory_space<vmem>>, vector<128x128xbf16>,
    %cst_61 = arith.constant dense<0.000000e+00> : vector<128xf32>
    %83 = vector.multi_reduction <add>, %80, %cst_61 [0] : vector<128x128xf32> to vector<128xf32>
    %84 = vector.shape_cast %83 : vector<128xf32> to vector<1x128xf32>
    %85 = arith.mulf %80, %80 : vector<128x128xf32>
    %cst_62 = arith.constant dense<0.000000e+00> : vector<128xf32>
    %86 = vector.multi_reduction <add>, %85, %cst_62 [0] : vector<128x128xf32> to vector<128xf32>
    %87 = vector.shape_cast %86 : vector<128xf32> to vector<1x128xf32>
    %88 = vector.shape_cast %84 : vector<1x128xf32> to vector<1x128xf32>
    %89 = vector.broadcast %88 : vector<1x128xf32> to vector<8x128xf32>
    %c0_63 = arith.constant 0 : index
    %c0_64 = arith.constant 0 : index
    %90 = vector.load %arg5[%c0_63, %c0_64] : memref<8x128xf32, #tpu.memory_space<vmem>>, vector<8x128xf32>
    tpu.vector_store %arg5[%c0_63, %c0_64], %89 {strides = array<i32>} : memref<8x128xf32, #tpu.memory_space<vmem>>, vector<8x128xf32>,
    %91 = vector.shape_cast %87 : vector<1x128xf32> to vector<1x128xf32>
    %92 = vector.broadcast %91 : vector<1x128xf32> to vector<8x128xf32>
    %c0_65 = arith.constant 0 : index
    %c0_66 = arith.constant 0 : index
    %93 = vector.load %arg6[%c0_65, %c0_66] : memref<8x128xf32, #tpu.memory_space<vmem>>, vector<8x128xf32>
    tpu.vector_store %arg6[%c0_65, %c0_66], %92 {strides = array<i32>} : memref<8x128xf32, #tpu.memory_space<vmem>>, vector<8x128xf32>,
    return
  }
  func.func @transform_0(%arg0: i32, %arg1: i32) -> (i32, i32, i32, i32) {
    %c0_i32 = arith.constant 0 : i32
    %c0_i32_0 = arith.constant 0 : i32
    %c0_i32_1 = arith.constant 0 : i32
    %c0_i32_2 = arith.constant 0 : i32
    return %arg0, %c0_i32, %c0_i32_0, %c0_i32_1 : i32, i32, i32, i32
  }
  func.func @transform_1(%arg0: i32, %arg1: i32) -> (i32, i32, i32) {
    %c0_i32 = arith.constant 0 : i32
    %c0_i32_0 = arith.constant 0 : i32
    %c0_i32_1 = arith.constant 0 : i32
    %c0_i32_2 = arith.constant 0 : i32
    return %c0_i32, %c0_i32_0, %c0_i32_1 : i32, i32, i32
  }
  func.func @transform_2(%arg0: i32, %arg1: i32) -> (i32, i32) {
    %c2_i32 = arith.constant 2 : i32
    %0 = arith.muli %arg0, %c2_i32 : i32
    %1 = arith.addi %0, %arg1 : i32
    %c0_i32 = arith.constant 0 : i32
    %c0_i32_0 = arith.constant 0 : i32
    return %1, %c0_i32 : i32, i32
  }
  func.func @transform_3(%arg0: i32, %arg1: i32) -> (i32, i32) {
    %c2_i32 = arith.constant 2 : i32
    %0 = arith.muli %arg0, %c2_i32 : i32
    %1 = arith.addi %0, %arg1 : i32
    %c0_i32 = arith.constant 0 : i32
    %c0_i32_0 = arith.constant 0 : i32
    return %1, %c0_i32 : i32, i32
  }
  func.func @transform_4(%arg0: i32, %arg1: i32) -> (i32, i32) {
    %c2_i32 = arith.constant 2 : i32
    %0 = arith.muli %arg0, %c2_i32 : i32
    %1 = arith.addi %0, %arg1 : i32
    %c0_i32 = arith.constant 0 : i32
    %c0_i32_0 = arith.constant 0 : i32
    return %1, %c0_i32 : i32, i32
  }
}

</mosaic_0001>

<bundles_post_ra>
// kernel: tpu_custom_call.1
= control target key start
LH: loop header
LB: loop body
LE: loop exit
PB: predicated region body
PF: predicated region fallthrough
CT: control target
= control target key end

     0   :  { %s4183_s0 = inlined_call_operand.vmem [shape: bf16[2,18,18,4], index: 0, kind: input, shape index: {}]   ;;  %s4184_s1 = inlined_call_operand.vmem [shape: bf16[9,4,128], index: 1, kind: input, shape index: {}]   ;;  %s4185_s2 = inlined_call_operand.hbm [shape: bf16[512,128], index: 2, kind: output, shape index: {0}]   ;;  %s4186_s3 = inlined_call_operand.hbm [shape: f32[32,128], index: 3, kind: output, shape index: {1}]   ;;  %s4187_s4 = inlined_call_operand.hbm [shape: f32[32,128], index: 4, kind: output, shape index: {2}]  }
   0x1   :  { %4190 = sst [smem:[#allocation9_spill]] %s4183_s0 }
   0x2   :  { %4191 = sst [smem:[#allocation10_spill]] %s4184_s1 }
   0x3   :  { %10 = vsyncpa [#allocation3], 0 }
   0x4   :  { %12 = vsyncpa [#allocation3 + $0x1], 0 }
   0x5   :  { %13 = vsyncpa [#allocation5], 0 }
   0x6   :  { %15 = vsyncpa [#allocation5 + $0x1], 0  ;;  %s3256_s15 = smov 0   ;;  %s3258_s16 = smov 0  }
   0x7   :  { %s3260_s17 = smov 0   ;;  %s3262_s18 = smov 0  }
   0x8   :  { %s3264_s19 = smov 0   ;;  %s3266_s20 = smov 0  }
   0x9   :  { %s3268_s21 = smov 0   ;;  %s3270_s22 = smov 0  }
   0xa LB: > { %s4189_s23 = sadd.s32 4294967295, %s3227_s22   ;;  %s30_s24 = sadd.s32 1, %s3219_s20  ;;  %s3227_s22 = sphi %s3270_s22, %s21_s22   ;;  %s3223_s21 = sphi %s3268_s21, %s4210_s21   ;;  %s3219_s20 = sphi %s3266_s20, %s4209_s20   ;;  %s3215_s19 = sphi %s3264_s19, %s4208_s19   ;;  %s3211_s18 = sphi %s3262_s18, %s4207_s18   ;;  %s3207_s17 = sphi %s3260_s17, %s4206_s17   ;;  %s3203_s16 = sphi %s3258_s16, %s4205_s16   ;;  %s3199_s15 = sphi %s3256_s15, %s4204_s15  }
   0xb   : > { %s33_s25 = sadd.s32 1, %s3223_s21  ;;  %p31_p0 = scmp.ge.s32.totalorder %s30_s24, 2 }
   0xc   : > { %s2585_s26 = sshll.u32 %s3223_s21, 1  ;;  %s4188_s27 = sadd.s32 4294967294, %s3227_s22  }
   0xd   : > { %s85_s28 = sadd.s32 %s3219_s20, %s2585_s26  ;;  %s4212_s24 = smov (%p31_p0, %s30_s24), 0 }
   0xe   : > { %s4214_s25 = smov (!%p31_p0, %s33_s25), %s3223_s21  ;;  %p101_p1 = scmp.ne.s32.totalorder %s3207_s17, %s3203_s16 }
   0xf   : > { %p102_p2 = scmp.eq.s32.totalorder %s4189_s23, 3  ;;  %p35_p3 = scmp.ge.s32.totalorder %s4214_s25, 2 }
  0x10   : > { %p107_p4 = scmp.ne.s32.totalorder %s3203_s16, %s3199_s15  ;;  %p108_p6 = scmp.eq.s32.totalorder %s4188_s27, 3 }
  0x11   : > { %p3311_p5 = por %p102_p2, %p101_p1  ;;  %s4216_s25 = smov (%p35_p3, %s4214_s25), 0 }
  0x12   : > { %p3319_p7 = por %p108_p6, %p107_p4  ;;  %p2593_p8 = scmp.ge.s32.totalorder %s3227_s22, 1 }
  0x13   : > { %s2586_s5 = sshll.u32 %s4216_s25, 1  ;;  %p197_p9 = scmp.lt.s32.totalorder %s3227_s22, 5 }
  0x14   : > { %s87_s6 = sadd.s32 %s2586_s5, %s4212_s24  ;;  %s91_s7 = sadd.s32 1, %s3207_s17 }
  0x15   : > { %s88_s8 = ssub.s32 %s85_s28, %s87_s6  ;;  %p198_p10 = pnand %p2593_p8, %p197_p9 }
  0x16   : > { %p89_p11 = scmp.eq.s32.totalorder %s88_s8, 0  ;;  %s4194_s1 = sld [smem:[#allocation10_spill]] (!%p198_p10) }
  0x17   : > { %201 = sbr.rel (%p198_p10) target bundleno = 512 (0x200), region = 28  ;;  %p233_p12 = scmp.lt.s32.totalorder (!%p198_p10), %s3215_s19, 1 }
  0x18   : > { %s3329_s9 = scalar_select %p89_p11, %s3207_s17, %s91_s7  }
  0x19   : > { %s2913_s26 = smul.u32 (!%p198_p10), 96, %s3211_s18  ;;  %s4195_s0 = sld [smem:[#allocation9_spill]] (!%p198_p10) }
  0x1a   : > { %s4059_s14 = sand.u32 (!%p198_p10), 1, %s3203_s16  }
  0x1c   : > { %v2601_v0 = vld [vmem:[%s4194_s1 + $0x2] sm:$0x3]  ;;  %vm521_vm0 = vcmask 1041408   ;;  %s234_s12 = scalar_select %p233_p12, %s3215_s19, 1  ;;  %v2658_v2 = vld [vmem:[%s4194_s1 + $0x4] sm:$0x3] }
  0x1d   : > { %v523_v1 = vsel %vm521_vm0, %v2601_v0, 0  ;;  %v824_v3 = vsel %vm521_vm0, %v2658_v2, 0  ;;  %v2685_v4 = vld [vmem:[%s4194_s1 + $0x6] sm:$0x3]  ;;  %v266_v5 = vld [vmem:[%s4194_s1] sm:$0x3] }
  0x1e   : > { %2986 = vmatpush.bf16.msra.mxu1 %v523_v1  ;;  %2987 = vmatpush.bf16.msra.mxu2 %v523_v1  ;;  %s2989_s28 = smul.u32 216, %s234_s12  ;;  %v978_v6 = vsel %vm521_vm0, %v2685_v4, 0  ;;  %v639_v7 = vsel %vm521_vm0, %v266_v5, 0  ;;  %v2750_v8 = vld [vmem:[%s4194_s1 + $0x8] sm:$0x3]  ;;  %vm496_vm3 = vcmask 31744  }
  0x1f   : > { %2988 = vmatpush.bf16.msra.mxu3 %v523_v1  ;;  %532 = vmatpush.bf16.msra.mxu0 %v523_v1  ;;  %v1312_v9 = vsel %vm521_vm0, %v2750_v8, 0  ;;  %vm275_vm1 = vsmask.f32 3328  ;;  %vm276_vm2 = vsmask.f32 7440  ;;  %vm714_vm5 = vcmask 1042432  }
  0x20   : > { %s237_s12 = scalar_lea.vmem %s4195_s0, %s2989_s28  ;;  %vm3385_vm4 = vmor %vm275_vm1, %vm276_vm2  ;;  %vm715_vm6 = vcmask 1046532  }
  0x21   : > { %s3357_s5 = scalar_lea.vmem %s237_s12, %s2913_s26  ;;  %vm3493_vm7 = vmor %vm714_vm5, %vm715_vm6  ;;  %s2594_s12 = sshll.u32 %s4059_s14, 6 }
  0x22   : > { %833 = vmatpush.bf16.msrb.mxu2 %v824_v3  ;;  %648 = vmatpush.bf16.msrb.mxu1 %v639_v7  ;;  %v254_v10 = vld [vmem:[%s3357_s5 + $0x18] sm:$0xf]  ;;  %v3361_v11 = vld [vmem:[%s3357_s5 + $0x1c] sm:$0xf]  ;;  %v3364_v12 = vld [vmem:[%s3357_s5 + $0x20] sm:$0x1] }
  0x23   : > { %987 = vmatpush.bf16.msrb.mxu3 %v978_v6  ;;  %1321 = vmatpush.bf16.msrb.mxu0 %v1312_v9  ;;  %v327_v13 = vshrl.u32 %v254_v10, 16  ;;  %v330_v14 = vshll.u32 %v254_v10, 16  ;;  %v336_v15 = vshll.u32 %v3361_v11, 16  ;;  %v340_v16 = vshrl.u32 %v3361_v11, 16  ;;  %v258_v17 = vld [vmem:[%s3357_s5 + $0x30] sm:$0xf] }
  0x24   : > { %v346_v18 = vshll.u32 %v3364_v12, 16  ;;  %v3371_v19 = vld [vmem:[%s3357_s5 + $0x34] sm:$0xf]  ;;  %v3374_v20 = vld [vmem:[%s3357_s5 + $0x38] sm:$0x1]  ;;  %v375_v21 = vshrl.u32 %v258_v17, 16 }
  0x25   : > { %v329_v22 = vrot.slane %v327_v13, 4  ;;  %v332_v23 = vrot.slane %v330_v14, 5  ;;  %v338_v24 = vrot.slane %v336_v15, 5  ;;  %v342_v25 = vrot.slane %v340_v16, 4  ;;  %v262_v26 = vld [vmem:[%s3357_s5 + $0x48] sm:$0xf] }
  0x26   : > { %v348_v27 = vrot.slane %v346_v18, 5  ;;  %v377_v28 = vrot.slane %v375_v21, 4  ;;  %v378_v29 = vshll.u32 %v258_v17, 16  ;;  %v384_v30 = vshll.u32 %v3371_v19, 16  ;;  %v3381_v35 = vld [vmem:[%s3357_s5 + $0x4c] sm:$0xf] }
  0x27   : > { %v333_v31 = vor.u32 %v332_v23, %v329_v22  ;;  %v343_v32 = vor.u32 %v342_v25, %v338_v24  ;;  %v388_v33 = vshrl.u32 %v3371_v19, 16  ;;  %v394_v34 = vshll.u32 %v3374_v20, 16  ;;  %v3390_v46 = vld [vmem:[%s3357_s5 + $0x50] sm:$0x1]  ;;  %v250_v54 = vld [vmem:[%s3357_s5] sm:$0xf] }
  0x28   : > { %v380_v37 = vrot.slane %v378_v29, 5  ;;  %v386_v38 = vrot.slane %v384_v30, 5  ;;  %v423_v39 = vshrl.u32 %v262_v26, 16  ;;  %v426_v40 = vshll.u32 %v262_v26, 16  ;;  %v3403_v2 = vld [vmem:[%s3357_s5 + $0x4] sm:$0xf] }
  0x29   : > { %v334_v41 = vrot.slane %v333_v31, 4  ;;  %v344_v42 = vrot.slane %v343_v32, 4  ;;  %v390_v43 = vrot.slane %v388_v33, 4  ;;  %v396_v44 = vrot.slane %v394_v34, 5  ;;  %v3408_v8 = vld [vmem:[%s3357_s5 + $0x8] sm:$0x1] }
  0x2a   : > { %v381_v45 = vor.u32 %v380_v37, %v377_v28  ;;  %v425_v47 = vrot.slane %v423_v39, 4  ;;  %v428_v48 = vrot.slane %v426_v40, 5  ;;  %v432_v49 = vshll.u32 %v3381_v35, 16  ;;  %v256_v15 = vld [vmem:[%s3357_s5 + $0x24] sm:$0xf]  ;;  %s2904_s26 = sshll.u32 %s3215_s19, 1 }
  0x2b   : > { %v339_v50 = vsel %vm3385_vm4, %v334_v41, %v338_v24  ;;  %v349_v51 = vsel %vm3385_vm4, %v344_v42, %v348_v27  ;;  %v391_v52 = vor.u32 %v390_v43, %v386_v38  ;;  %v436_v53 = vshrl.u32 %v3381_v35, 16  ;;  %v3419_v26 = vld [vmem:[%s3357_s5 + $0x28] sm:$0xf]  ;;  %v3424_v30 = vld [vmem:[%s3357_s5 + $0x2c] sm:$0x1]  ;;  %s4086_s28 = sadd.s32 %s3211_s18, %s2904_s26 }
  0x2c   : > { %v476_v55 = vunpack.c.l.b16 %v339_v50  ;;  %v477_v56 = vunpack.c.l.b16 %v349_v51  ;;  %v382_v57 = vrot.slane %v381_v45, 4  ;;  %v429_v58 = vor.u32 %v428_v48, %v425_v47  ;;  %v3432_v51 = vld [vmem:[%s3357_s5 + $0x40] sm:$0xf]  ;;  %s2938_s6 = sshll.u32 %s4086_s28, 6  ;;  %s2908_s13 = sshll.u32 %s4086_s28, 3 }
  0x2d   : > { %v392_v59 = vrot.slane %v391_v52, 4  ;;  %v434_v60 = vrot.slane %v432_v49, 5  ;;  %v438_v61 = vrot.slane %v436_v53, 4  ;;  %v442_v62 = vshll.u32 %v3390_v46, 16  ;;  %s2395_s8 = scalar_lea.hbm %s4185_s2, %s2938_s6 }
  0x2e   : > { %v490_v63 = vpack.c.b16 %v477_v56, %v476_v55  ;;  %v387_v0 = vsel %vm3385_vm4, %v382_v57, %v386_v38  ;;  %v430_v1 = vrot.slane %v429_v58, 4  ;;  %v279_v3 = vshrl.u32 %v250_v54, 16  ;;  %v260_v38 = vld [vmem:[%s3357_s5 + $0x3c] sm:$0xf]  ;;  %v3438_v56 = vld [vmem:[%s3357_s5 + $0x44] sm:$0x1] }
  0x2f   : > { %v397_v4 = vsel %vm3385_vm4, %v392_v59, %v396_v44  ;;  %v480_v5 = vunpack.c.l.b16 %v387_v0  ;;  %v439_v6 = vor.u32 %v438_v61, %v434_v60  ;;  %v444_v7 = vrot.slane %v442_v62, 5  ;;  %v264_v58 = vld [vmem:[%s3357_s5 + $0x54] sm:$0xf]  ;;  %s2398_s10 = sshll.u32 %s2395_s8, 4  ;;  %s3093_s8 = scalar_lea.hbm %s4185_s2, 256  ;;  %s2399_s10 = int_to_ptr.hbm [resolvable:$true] %s2398_s10 }
  0x30   : > { %2604 = vmatmul.msk.bf16.vlgmr.msra.gmra.mxu1 %vm496_vm3, %v490_v63  ;;  %v481_v9 = vunpack.c.l.b16 %v397_v4  ;;  %v435_v10 = vsel %vm3385_vm4, %v430_v1, %v434_v60  ;;  %v281_v13 = vrot.slane %v279_v3, 4  ;;  %v282_v14 = vshll.u32 %v250_v54, 16  ;;  %s3087_s26 = sshra.s32 %s2399_s10, 4  ;;  %s3088_s26 = int_to_ptr.hbm [resolvable:$true] %s3087_s26 }
  0x31   : > { %v440_v16 = vrot.slane %v439_v6, 4  ;;  %v484_v17 = vunpack.c.l.b16 %v435_v10  ;;  %v288_v18 = vshll.u32 %v3403_v2, 16  ;;  %v292_v21 = vshrl.u32 %v3403_v2, 16  ;;  %s3089_s6 = scalar_lea.hbm %s3088_s26, 64  ;;  %p3094_p2 = scmp.lt.s32.totalorder %s3088_s26, %s4185_s2 }
  0x32   : > { %v492_v22 = vpack.c.b16 %v481_v9, %v480_v5  ;;  %v284_v23 = vrot.slane %v282_v14, 5  ;;  %v298_v24 = vshll.u32 %v3408_v8, 16  ;;  %v722_v25 = vrot.slane %v3408_v8, 5  ;;  %p3090_p13 = scmp.ne.s32.totalorder %s3088_s26, %s3089_s6  ;;  %p3095_p3 = scmp.lt.s32.totalorder %s3093_s8, %s3089_s6 }
  0x33   : > { %v445_v27 = vsel %vm3385_vm4, %v440_v16, %v444_v7  ;;  %v290_v28 = vrot.slane %v288_v18, 5  ;;  %v294_v29 = vrot.slane %v292_v21, 4  ;;  %v351_v31 = vshrl.u32 %v256_v15, 16  ;;  %v3452_v16 = vld [vmem:[%s3357_s5 + $0x5c] sm:$0x1] }
  0x34   : > { %2606 = vmatmul.msk.bf16.vlgmr.msra.gmra.mxu2 %vm496_vm3, %v492_v22  ;;  %v485_v32 = vunpack.c.l.b16 %v445_v27  ;;  %v285_v33 = vor.u32 %v284_v23, %v281_v13  ;;  %v300_v34 = vrot.slane %v298_v24, 5  ;;  %v354_v37 = vshll.u32 %v256_v15, 16  ;;  %v3449_v15 = vld [vmem:[%s3357_s5 + $0x58] sm:$0xf]  ;;  %v252_v23 = vld [vmem:[%s3357_s5 + $0xc] sm:$0xf]  ;;  %p3091_p0 = pnand %p3090_p13, %p3311_p5  ;;  %p3096_p4 = por %p3095_p3, %p3094_p2 }
  0x35   : > { %v295_v39 = vor.u32 %v294_v29, %v290_v28  ;;  %v353_v40 = vrot.slane %v351_v31, 4  ;;  %v360_v41 = vshll.u32 %v3419_v26, 16  ;;  %v364_v42 = vshrl.u32 %v3419_v26, 16 }
  0x36   : > { %v494_v43 = vpack.c.b16 %v485_v32, %v484_v17  ;;  %v286_v44 = vrot.slane %v285_v33, 4  ;;  %v356_v45 = vrot.slane %v354_v37, 5  ;;  %v370_v47 = vshll.u32 %v3424_v30, 16  ;;  %p3092_p1 = pneg %p3091_p0 }
  0x37   : > { %v296_v48 = vrot.slane %v295_v39, 4  ;;  %v362_v49 = vrot.slane %v360_v41, 5  ;;  %v366_v50 = vrot.slane %v364_v42, 4  ;;  %v399_v52 = vshrl.u32 %v260_v38, 16 }
  0x38   : > { %2608 = vmatmul.msk.bf16.vlgmr.msra.gmra.mxu3 %vm496_vm3, %v494_v43  ;;  %v291_v53 = vsel %vm3385_vm4, %v286_v44, %v290_v28  ;;  %v357_v54 = vor.u32 %v356_v45, %v353_v40  ;;  %v372_v55 = vrot.slane %v370_v47, 5  ;;  %v402_v57 = vshll.u32 %v260_v38, 16  ;;  %v3464_v40 = vld [vmem:[%s3357_s5 + $0x10] sm:$0xf]  ;;  %v3467_v47 = vld [vmem:[%s3357_s5 + $0x14] sm:$0x1]  ;;  %p3097_p6 = pnand %p3096_p4, %p3092_p1 }
  0x39   : > { %v301_v59 = vsel %vm3385_vm4, %v296_v48, %v300_v34  ;;  %v472_v60 = vunpack.c.l.b16 %v291_v53  ;;  %v367_v61 = vor.u32 %v366_v50, %v362_v49  ;;  %v401_v62 = vrot.slane %v399_v52, 4 }
  0x3a   : > { %v473_v63 = vunpack.c.l.b16 %v301_v59  ;;  %v358_v0 = vrot.slane %v357_v54, 4  ;;  %v404_v1 = vrot.slane %v402_v57, 5  ;;  %v408_v3 = vshll.u32 %v3432_v51, 16 }
  0x3b   : > { %v368_v4 = vrot.slane %v367_v61, 4  ;;  %v412_v5 = vshrl.u32 %v3432_v51, 16  ;;  %v418_v6 = vshll.u32 %v3438_v56, 16  ;;  %v447_v7 = vshrl.u32 %v264_v58, 16 }
  0x3c   : > { %v488_v9 = vpack.c.b16 %v473_v63, %v472_v60  ;;  %v363_v10 = vsel %vm3385_vm4, %v358_v0, %v362_v49  ;;  %v405_v13 = vor.u32 %v404_v1, %v401_v62  ;;  %v410_v14 = vrot.slane %v408_v3, 5  ;;  %v690_v1 = vld [vmem:[%s3357_s5] sm:$0xe] }
  0x3d   : > { %v373_v17 = vsel %vm3385_vm4, %v368_v4, %v372_v55  ;;  %v478_v18 = vunpack.c.l.b16 %v363_v10  ;;  %v414_v21 = vrot.slane %v412_v5, 4  ;;  %v420_v22 = vrot.slane %v418_v6, 5 }
  0x3e   : > { %2602 = vmatmul.msk.bf16.vlgmr.msra.gmra.mxu0 %vm496_vm3, %v488_v9  ;;  %v479_v24 = vunpack.c.l.b16 %v373_v17  ;;  %v406_v27 = vrot.slane %v405_v13, 4  ;;  %v449_v28 = vrot.slane %v447_v7, 4  ;;  %v450_v29 = vshll.u32 %v264_v58, 16  ;;  %v2802_v7 = vld [vmem:[%s4194_s1 + $0xc] sm:$0x3] }
  0x3f   : > { %v415_v31 = vor.u32 %v414_v21, %v410_v14  ;;  %v456_v32 = vshll.u32 %v3449_v15, 16  ;;  %v460_v33 = vshrl.u32 %v3449_v15, 16  ;;  %v466_v34 = vshll.u32 %v3452_v16, 16  ;;  %v2726_v9 = vld [vmem:[%s3357_s5 + $0xc] sm:$0xf] }
  0x40   : > { %v491_v37 = vpack.c.b16 %v479_v24, %v478_v18  ;;  %v411_v38 = vsel %vm3385_vm4, %v406_v27, %v410_v14  ;;  %v452_v39 = vrot.slane %v450_v29, 5  ;;  %v303_v41 = vshrl.u32 %v252_v23, 16  ;;  %v3488_v27 = vld [vmem:[%s3357_s5 + $0x10] sm:$0xf] }
  0x41   : > { %v416_v42 = vrot.slane %v415_v31, 4  ;;  %v482_v43 = vunpack.c.l.b16 %v411_v38  ;;  %v458_v44 = vrot.slane %v456_v32, 5  ;;  %v462_v45 = vrot.slane %v460_v33, 4 }
  0x42   : > { %2605 = vmatmul.msk.bf16.gmra.mxu1 %vm496_vm3, %v491_v37  ;;  %v453_v48 = vor.u32 %v452_v39, %v449_v28  ;;  %v468_v49 = vrot.slane %v466_v34, 5  ;;  %v305_v50 = vrot.slane %v303_v41, 4  ;;  %v306_v52 = vshll.u32 %v252_v23, 16  ;;  %v3498_v37 = vld [vmem:[%s3357_s5 + $0x14] sm:$0x1] }
  0x43   : > { %v421_v53 = vsel %vm3385_vm4, %v416_v42, %v420_v22  ;;  %v463_v54 = vor.u32 %v462_v45, %v458_v44  ;;  %v312_v55 = vshll.u32 %v3464_v40, 16  ;;  %v316_v57 = vshrl.u32 %v3464_v40, 16  ;;  %v2867_v41 = vld [vmem:[%s4194_s1 + $0xe] sm:$0x3]  ;;  %v2775_v45 = vld [vmem:[%s4194_s1 + $0xa] sm:$0x3] }
  0x44   : > { %v483_v58 = vunpack.c.l.b16 %v421_v53  ;;  %v454_v59 = vrot.slane %v453_v48, 4  ;;  %v308_v60 = vrot.slane %v306_v52, 5  ;;  %v322_v61 = vshll.u32 %v3467_v47, 16  ;;  %v2892_v53 = vld [vmem:[%s4194_s1 + $0x10] sm:$0x3] }
  0x45   : > { %v464_v62 = vrot.slane %v463_v54, 4  ;;  %v314_v63 = vrot.slane %v312_v55, 5  ;;  %v318_v0 = vrot.slane %v316_v57, 4  ;;  %v2650_v21 = vrot.slane %v690_v1, 9  ;;  %v2914_v55 = vld [vmem:[%s3357_s5] sm:$0xff] }
  0x46   : > { %v493_v3 = vpack.c.b16 %v483_v58, %v482_v43  ;;  %v459_v4 = vsel %vm3385_vm4, %v454_v59, %v458_v44  ;;  %v309_v5 = vor.u32 %v308_v60, %v305_v50  ;;  %v324_v6 = vrot.slane %v322_v61, 5 }
  0x47   : > { %v469_v10 = vsel %vm3385_vm4, %v464_v62, %v468_v49  ;;  %v486_v13 = vunpack.c.l.b16 %v459_v4  ;;  %v319_v14 = vor.u32 %v318_v0, %v314_v63  ;;  %v719_v22 = vrot.slane %v3403_v2, 5  ;;  %v3529_v4 = vld [vmem:[%s3357_s5 + $0x1c] sm:$0xf] }
  0x48   : > { %2607 = vmatmul.msk.bf16.gmra.mxu2 %vm496_vm3, %v493_v3  ;;  %v487_v17 = vunpack.c.l.b16 %v469_v10  ;;  %v310_v18 = vrot.slane %v309_v5, 4  ;;  %v1672_v24 = vsel %vm521_vm0, %v2802_v7, 0  ;;  %v1070_v28 = vshrl.u32 %v2726_v9, 16  ;;  %v2729_v3 = vld [vmem:[%s3357_s5 + $0x18] sm:$0xf] }
  0x49   : > { %v320_v23 = vrot.slane %v319_v14, 4  ;;  %v1073_v29 = vshll.u32 %v2726_v9, 16  ;;  %v721_v34 = vrot.slane %v719_v22, 4  ;;  %1681 = vmatpush.bf16.msra.mxu2 %v1672_v24  ;;  %v1079_v44 = vshll.u32 %v3488_v27, 16  ;;  %v692_v5 = vld [vmem:[%s3357_s5 + $0x18] sm:$0xe] }
  0x4a   : > { %v495_v31 = vpack.c.b16 %v487_v17, %v486_v13  ;;  %v315_v32 = vsel %vm3385_vm4, %v310_v18, %v314_v63  ;;  %v1072_v39 = vrot.slane %v1070_v28, 4  ;;  %v720_v48 = vsel %vm3493_vm7, %v2650_v21, %v719_v22  ;;  %v691_v7 = vld [vmem:[%s3357_s5 + $0xc] sm:$0xe] }
  0x4b   : > { %v325_v2 = vsel %vm3385_vm4, %v320_v23, %v324_v6  ;;  %v474_v38 = vunpack.c.l.b16 %v315_v32  ;;  %v1075_v43 = vrot.slane %v1073_v29, 5  ;;  %v723_v49 = vsel %vm3493_vm7, %v721_v34, %v722_v25  ;;  %v2922_v34 = vld [vmem:[%s3357_s5 + $0xc] sm:$0xff] }
  0x4c   : > { %2609 = vmatmul.msk.bf16.gmra.mxu3 %vm496_vm3, %v495_v31  ;;  %v475_v42 = vunpack.c.l.b16 %v325_v2  ;;  %v1083_v50 = vshrl.u32 %v3488_v27, 16  ;;  %v1089_v52 = vshll.u32 %v3498_v37, 16  ;;  %v1081_v58 = vrot.slane %v1079_v44, 5 }
  0x4d   : > { %v1076_v57 = vor.u32 %v1075_v43, %v1072_v39  ;;  %v2006_v59 = vsel %vm521_vm0, %v2867_v41, 0  ;;  %v1518_v25 = vsel %vm521_vm0, %v2775_v45, 0  ;;  %v775_v60 = vunpack.c.l.b16 %v720_v48 }
  0x4e   : > { %v489_v54 = vpack.c.b16 %v475_v42, %v474_v38  ;;  %v1085_v8 = vrot.slane %v1083_v50, 4  ;;  %2015 = vmatpush.bf16.msra.mxu3 %v2006_v59  ;;  %v776_v61 = vunpack.c.l.b16 %v723_v49  ;;  %1527 = vmatpush.bf16.msra.mxu1 %v1518_v25  ;;  %v2212_v63 = vsel %vm521_vm0, %v2892_v53, 0 }
  0x4f   : > { %v1077_v62 = vrot.slane %v1076_v57, 4  ;;  %v1091_v1 = vrot.slane %v1089_v52, 5  ;;  %2221 = vmatpush.bf16.msra.mxu0 %v2212_v63  ;;  %v726_v9 = vrot.slane %v3464_v40, 5  ;;  %v1094_v14 = vshrl.u32 %v2729_v3, 16  ;;  %v693_v63 = vld [vmem:[%s3357_s5 + $0x24] sm:$0xe] }
  0x50   : > { %2603 = vmatmul.msk.bf16.gmra.mxu0 %vm496_vm3, %v489_v54  ;;  %v1086_v0 = vor.u32 %v1085_v8, %v1081_v58  ;;  %v791_v10 = vpack.c.b16 %v776_v61, %v775_v60  ;;  %v1097_v17 = vshll.u32 %v2729_v3, 16  ;;  %v1103_v21 = vshll.u32 %v3529_v4, 16  ;;  %v2732_v61 = vld [vmem:[%s3357_s5 + $0x24] sm:$0xf] }
  0x51   : > { %v1082_v13 = vsel %vm3385_vm4, %v1077_v62, %v1081_v58  ;;  %v1107_v22 = vshrl.u32 %v3529_v4, 16  ;;  %v2652_v23 = vrot.slane %v692_v5, 9  ;;  %v2651_v24 = vrot.slane %v691_v7, 9  ;;  %v3563_v62 = vld [vmem:[%s3357_s5 + $0x28] sm:$0xf] }
  0x52   : > { %2642 = vmatmul.msk.bf16.vlgmr.msrb.gmra.mxu1 %vm496_vm3, %v2914_v55  ;;  %v1087_v6 = vrot.slane %v1086_v0, 4  ;;  %v733_v28 = vrot.slane %v3361_v11, 5  ;;  %v1263_v40 = vunpack.c.l.b16 %v1082_v13  ;;  %v728_v29 = vrot.slane %v726_v9, 4  ;;  %v3548_v11 = vld [vmem:[%s3357_s5 + $0x20] sm:$0x1]  ;;  %v2915_v55 = vld [vmem:[%s3357_s5 + $0xc] sm:$0xff] }
  0x53   : > { %v729_v31 = vrot.slane %v3467_v47, 5  ;;  %v736_v32 = vrot.slane %v3364_v12, 5  ;;  %v1096_v38 = vrot.slane %v1094_v14, 4  ;;  %v1099_v39 = vrot.slane %v1097_v17, 5 }
  0x54   : > { %v1092_v18 = vsel %vm3385_vm4, %v1087_v6, %v1091_v1  ;;  %v734_v41 = vsel %vm3493_vm7, %v2652_v23, %v733_v28  ;;  %v1105_v42 = vrot.slane %v1103_v21, 5  ;;  %v1109_v43 = vrot.slane %v1107_v22, 4  ;;  %v2923_v22 = vld [vmem:[%s3357_s5 + $0x18] sm:$0xff] }
  0x55   : > { %v1264_v2 = vunpack.c.l.b16 %v1092_v18  ;;  %v735_v44 = vrot.slane %v733_v28, 4  ;;  %v779_v45 = vunpack.c.l.b16 %v734_v41  ;;  %v727_v47 = vsel %vm3493_vm7, %v2651_v24, %v726_v9 }
  0x56   : > { %v730_v49 = vsel %vm3493_vm7, %v728_v29, %v729_v31  ;;  %v1100_v50 = vor.u32 %v1099_v39, %v1096_v38  ;;  %v1110_v53 = vor.u32 %v1109_v43, %v1105_v42  ;;  %v1113_v54 = vshll.u32 %v3548_v11, 16  ;;  %v2735_v43 = vld [vmem:[%s3357_s5 + $0x30] sm:$0xf] }
  0x57   : > { %v737_v12 = vsel %vm3493_vm7, %v735_v44, %v736_v32  ;;  %v1279_v48 = vpack.c.b16 %v1264_v2, %v1263_v40  ;;  %v777_v58 = vunpack.c.l.b16 %v727_v47  ;;  %v778_v59 = vunpack.c.l.b16 %v730_v49  ;;  %v3589_v44 = vld [vmem:[%s3357_s5 + $0x34] sm:$0xf] }
  0x58   : > { %2659 = vmatmul.msk.bf16.vlgmr.msrb.gmra.mxu2 %vm496_vm3, %v791_v10  ;;  %v780_v52 = vunpack.c.l.b16 %v737_v12  ;;  %v1101_v8 = vrot.slane %v1100_v50, 4  ;;  %v1111_v25 = vrot.slane %v1110_v53, 4  ;;  %v1115_v60 = vrot.slane %v1113_v54, 5 }
  0x59   : > { %v740_v0 = vrot.slane %v3419_v26, 5  ;;  %v743_v1 = vrot.slane %v3424_v30, 5  ;;  %v792_v3 = vpack.c.b16 %v778_v59, %v777_v58  ;;  %v2653_v5 = vrot.slane %v693_v63, 9  ;;  %v3601_v63 = vld [vmem:[%s3357_s5 + $0x38] sm:$0x1] }
  0x5a   : > { %v793_v57 = vpack.c.b16 %v780_v52, %v779_v45  ;;  %v1106_v6 = vsel %vm3385_vm4, %v1101_v8, %v1105_v42  ;;  %v1118_v7 = vshrl.u32 %v2732_v61, 16  ;;  %v1121_v9 = vshll.u32 %v2732_v61, 16  ;;  %v2916_v42 = vld [vmem:[%s3357_s5 + $0x18] sm:$0xff] }
  0x5b   : > { %v742_v10 = vrot.slane %v740_v0, 4  ;;  %v1116_v13 = vsel %vm3385_vm4, %v1111_v25, %v1115_v60  ;;  %v1127_v14 = vshll.u32 %v3563_v62, 16  ;;  %v1131_v17 = vshrl.u32 %v3563_v62, 16  ;;  %v2924_v25 = vld [vmem:[%s3357_s5 + $0x24] sm:$0xff] }
  0x5c   : > { %2718 = vmatmul.msk.bf16.vlgmr.msrb.gmra.mxu3 %vm496_vm3, %v2922_v34  ;;  %v741_v26 = vsel %vm3493_vm7, %v2653_v5, %v740_v0  ;;  %v1265_v23 = vunpack.c.l.b16 %v1106_v6  ;;  %v1266_v24 = vunpack.c.l.b16 %v1116_v13  ;;  %v1120_v28 = vrot.slane %v1118_v7, 4  ;;  %v3581_v34 = vld [vmem:[%s3357_s5 + $0x2c] sm:$0x1]  ;;  %v2917_v6 = vld [vmem:[%s3357_s5 + $0x24] sm:$0xff]  ;;  %v3609_v13 = vld [vmem:[%s3357_s5 + $0x40] sm:$0xf] }
  0x5d   : > { %v744_v30 = vsel %vm3493_vm7, %v742_v10, %v743_v1  ;;  %v781_v18 = vunpack.c.l.b16 %v741_v26  ;;  %v1123_v40 = vrot.slane %v1121_v9, 5  ;;  %v1129_v29 = vrot.slane %v1127_v14, 5  ;;  %v694_v26 = vld [vmem:[%s3357_s5 + $0x30] sm:$0xe] }
  0x5e   : > { %v782_v21 = vunpack.c.l.b16 %v744_v30  ;;  %v1133_v31 = vrot.slane %v1131_v17, 4  ;;  %v1280_v2 = vpack.c.b16 %v1266_v24, %v1265_v23  ;;  %v1137_v41 = vshll.u32 %v3581_v34, 16 }
  0x5f   : > { %v1124_v38 = vor.u32 %v1123_v40, %v1120_v28  ;;  %v1145_v49 = vshll.u32 %v2735_v43, 16  ;;  %v1151_v50 = vshll.u32 %v3589_v44, 16  ;;  %v1155_v52 = vshrl.u32 %v3589_v44, 16 }
  0x60   : > { %2751 = vmatmul.msk.bf16.vlgmr.msrb.gmra.mxu0 %vm496_vm3, %v1279_v48  ;;  %v794_v32 = vpack.c.b16 %v782_v21, %v781_v18  ;;  %v1134_v39 = vor.u32 %v1133_v31, %v1129_v29  ;;  %v1139_v12 = vrot.slane %v1137_v41, 5  ;;  %v1142_v48 = vshrl.u32 %v2735_v43, 16  ;;  %v3624_v43 = vld [vmem:[%s3357_s5 + $0x44] sm:$0x1] }
  0x61   : > { %v1125_v45 = vrot.slane %v1124_v38, 4  ;;  %v1147_v58 = vrot.slane %v1145_v49, 5  ;;  %v1153_v59 = vrot.slane %v1151_v50, 5  ;;  %v1157_v8 = vrot.slane %v1155_v52, 4  ;;  %v2918_v49 = vld [vmem:[%s3357_s5 + $0x30] sm:$0xff] }
  0x62   : > { %2643 = vmatmul.msk.bf16.gmra.mxu1 %vm496_vm3, %v2915_v55  ;;  %v1135_v47 = vrot.slane %v1134_v39, 4  ;;  %v1144_v55 = vrot.slane %v1142_v48, 4  ;;  %v1175_v21 = vshll.u32 %v3609_v13, 16  ;;  %v747_v23 = vrot.slane %v3371_v19, 5 }
  0x63   : > { %v1130_v53 = vsel %vm3385_vm4, %v1125_v45, %v1129_v29  ;;  %v1158_v1 = vor.u32 %v1157_v8, %v1153_v59  ;;  %v2654_v40 = vrot.slane %v694_v26, 9  ;;  %v2925_v29 = vld [vmem:[%s3357_s5 + $0x30] sm:$0xff] }
  0x64   : > { %v1140_v54 = vsel %vm3385_vm4, %v1135_v47, %v1139_v12  ;;  %v1267_v60 = vunpack.c.l.b16 %v1130_v53  ;;  %v1148_v0 = vor.u32 %v1147_v58, %v1144_v55  ;;  %v1177_v38 = vrot.slane %v1175_v21, 5  ;;  %v2741_v55 = vld [vmem:[%s3357_s5 + $0x48] sm:$0xf]  ;;  %v3637_v58 = vld [vmem:[%s3357_s5 + $0x4c] sm:$0xf] }
  0x65   : > { %v1268_v61 = vunpack.c.l.b16 %v1140_v54  ;;  %v1159_v9 = vrot.slane %v1158_v1, 4  ;;  %v749_v41 = vrot.slane %v747_v23, 4  ;;  %v748_v19 = vsel %vm3493_vm7, %v2654_v40, %v747_v23  ;;  %v2919_v40 = vld [vmem:[%s3357_s5 + $0x3c] sm:$0xff] }
  0x66   : > { %v1149_v7 = vrot.slane %v1148_v0, 4  ;;  %v1185_v12 = vshll.u32 %v3624_v43, 16  ;;  %v1190_v0 = vshrl.u32 %v2741_v55, 16  ;;  %v1193_v1 = vshll.u32 %v2741_v55, 16 }
  0x67   : > { %v1281_v5 = vpack.c.b16 %v1268_v61, %v1267_v60  ;;  %v754_v60 = vrot.slane %v3432_v51, 5  ;;  %v695_v61 = vld [vmem:[%s3357_s5 + $0x3c] sm:$0xe] }
  0x68   : > { %2660 = vmatmul.msk.bf16.gmra.mxu2 %vm496_vm3, %v792_v3  ;;  %v1161_v3 = vshll.u32 %v3601_v63, 16  ;;  %v1154_v14 = vsel %vm3385_vm4, %v1149_v7, %v1153_v59  ;;  %v1187_v54 = vrot.slane %v1185_v12, 5  ;;  %v2926_v7 = vld [vmem:[%s3357_s5 + $0x3c] sm:$0xff]  ;;  %v1195_v51 = vrot.slane %v1193_v1, 5 }
  0x69   : > { %v1269_v24 = vunpack.c.l.b16 %v1154_v14  ;;  %v757_v14 = vrot.slane %v3438_v56, 5  ;;  %v3678_v1 = vld [vmem:[%s3357_s5 + $0x5c] sm:$0x1] }
  0x6a   : > { %v1163_v10 = vrot.slane %v1161_v3, 5  ;;  %v1199_v3 = vshll.u32 %v3637_v58, 16 }
  0x6c   : > { %2719 = vmatmul.msk.bf16.gmra.mxu3 %vm496_vm3, %v2923_v22  ;;  %v1164_v17 = vsel %vm3385_vm4, %v1159_v9, %v1163_v10  ;;  %v1179_v22 = vshrl.u32 %v3609_v13, 16  ;;  %v2655_v10 = vrot.slane %v695_v61, 9  ;;  %v1201_v26 = vrot.slane %v1199_v3, 5 }
  0x6d   : > { %v1270_v28 = vunpack.c.l.b16 %v1164_v17  ;;  %v1192_v17 = vrot.slane %v1190_v0, 4  ;;  %v764_v61 = vrot.slane %v3390_v46, 5  ;;  %v1233_v46 = vshll.u32 %v3678_v1, 16 }
  0x6e   : > { %v1181_v39 = vrot.slane %v1179_v22, 4  ;;  %v755_v22 = vsel %vm3493_vm7, %v2655_v10, %v754_v60  ;;  %v2920_v10 = vld [vmem:[%s3357_s5 + $0x48] sm:$0xff] }
  0x6f   : > { %v1282_v45 = vpack.c.b16 %v1270_v28, %v1269_v24  ;;  %v1196_v24 = vor.u32 %v1195_v51, %v1192_v17 }
  0x70   : > { %2752 = vmatmul.msk.bf16.gmra.mxu0 %vm496_vm3, %v1280_v2  ;;  %v1182_v47 = vor.u32 %v1181_v39, %v1177_v38 }
  0x72   : > { %2644 = vmatmul.msk.bf16.gmra.mxu1 %vm496_vm3, %v2916_v42  ;;  %v750_v42 = vrot.slane %v3374_v20, 5  ;;  %v783_v20 = vunpack.c.l.b16 %v748_v19  ;;  %v1183_v53 = vrot.slane %v1182_v47, 4 }
  0x74   : > { %v751_v48 = vsel %vm3493_vm7, %v749_v41, %v750_v42  ;;  %v3663_v42 = vld [vmem:[%s3357_s5 + $0x58] sm:$0xf] }
  0x75   : > { %v784_v50 = vunpack.c.l.b16 %v751_v48  ;;  %v1223_v47 = vshll.u32 %v3663_v42, 16 }
  0x77   : > { %v795_v59 = vpack.c.b16 %v784_v50, %v783_v20  ;;  %v1227_v20 = vshrl.u32 %v3663_v42, 16  ;;  %v696_v50 = vld [vmem:[%s3357_s5 + $0x48] sm:$0xe] }
  0x78   : > { %2661 = vmatmul.msk.bf16.gmra.mxu2 %vm496_vm3, %v793_v57  ;;  %v2738_v57 = vld [vmem:[%s3357_s5 + $0x3c] sm:$0xf] }
  0x79   : > { %v1166_v30 = vshrl.u32 %v2738_v57, 16  ;;  %v1169_v18 = vshll.u32 %v2738_v57, 16  ;;  %v756_v57 = vrot.slane %v754_v60, 4  ;;  %v1229_v0 = vrot.slane %v1227_v20, 4 }
  0x7b   : > { %v1168_v31 = vrot.slane %v1166_v30, 4  ;;  %v1171_v2 = vrot.slane %v1169_v18, 5  ;;  %v3651_v18 = vld [vmem:[%s3357_s5 + $0x50] sm:$0x1]  ;;  %v758_v23 = vsel %vm3493_vm7, %v756_v57, %v757_v14 }
  0x7c   : > { %2720 = vmatmul.msk.bf16.gmra.mxu3 %vm496_vm3, %v2924_v25  ;;  %v1188_v25 = vsel %vm3385_vm4, %v1183_v53, %v1187_v54  ;;  %v1209_v56 = vshll.u32 %v3651_v18, 16  ;;  %v2927_v54 = vld [vmem:[%s3357_s5 + $0x48] sm:$0xff] }
  0x7d   : > { %v1272_v9 = vunpack.c.l.b16 %v1188_v25  ;;  %v2656_v25 = vrot.slane %v696_v50, 9  ;;  %v3711_v50 = vld [vmem:[%s3357_s5 + $0x68] sm:$0x1] }
  0x7e   : > { %v1211_v41 = vrot.slane %v1209_v56, 5 }
  0x80   : > { %2753 = vmatmul.msk.bf16.gmra.mxu0 %vm496_vm3, %v1281_v5  ;;  %v1203_v5 = vshrl.u32 %v3637_v58, 16 }
  0x82   : > { %2645 = vmatmul.msk.bf16.gmra.mxu1 %vm496_vm3, %v2917_v6  ;;  %v1205_v30 = vrot.slane %v1203_v5, 4 }
  0x84   : > { %v1206_v28 = vor.u32 %v1205_v30, %v1201_v26  ;;  %v2747_v30 = vld [vmem:[%s3357_s5 + $0x60] sm:$0xf] }
  0x86   : > { %v1207_v39 = vrot.slane %v1206_v28, 4  ;;  %v1241_v28 = vshll.u32 %v2747_v30, 16 }
  0x88   : > { %2662 = vmatmul.msk.bf16.gmra.mxu2 %vm496_vm3, %v794_v32  ;;  %v1172_v32 = vor.u32 %v1171_v2, %v1168_v31  ;;  %v786_v31 = vunpack.c.l.b16 %v758_v23  ;;  %v2744_v2 = vld [vmem:[%s3357_s5 + $0x54] sm:$0xf]  ;;  %v1212_v48 = vsel %vm3385_vm4, %v1207_v39, %v1211_v41 }
  0x89   : > { %v1217_v19 = vshll.u32 %v2744_v2, 16 }
  0x8a   : > { %v1173_v52 = vrot.slane %v1172_v32, 4 }
  0x8b   : > { %v1219_v53 = vrot.slane %v1217_v19, 5 }
  0x8c   : > { %2721 = vmatmul.msk.bf16.gmra.mxu3 %vm496_vm3, %v2925_v29  ;;  %v1178_v8 = vsel %vm3385_vm4, %v1173_v52, %v1177_v38  ;;  %v785_v29 = vunpack.c.l.b16 %v755_v22  ;;  %v1197_v38 = vrot.slane %v1196_v24, 4  ;;  %v1238_v24 = vshrl.u32 %v2747_v30, 16 }
  0x8d   : > { %v1271_v6 = vunpack.c.l.b16 %v1178_v8  ;;  %v1225_v8 = vrot.slane %v1223_v47, 5  ;;  %v1243_v47 = vrot.slane %v1241_v28, 5 }
  0x8e   : > { %v796_v32 = vpack.c.b16 %v786_v31, %v785_v29  ;;  %v1202_v12 = vsel %vm3385_vm4, %v1197_v38, %v1201_v26  ;;  %v1235_v26 = vrot.slane %v1233_v46, 5  ;;  %v768_v31 = vrot.slane %v3449_v15, 5  ;;  %v697_v38 = vld [vmem:[%s3357_s5 + $0x54] sm:$0xe] }
  0x8f   : > { %v1283_v21 = vpack.c.b16 %v1272_v9, %v1271_v6  ;;  %v1273_v55 = vunpack.c.l.b16 %v1202_v12  ;;  %v1230_v9 = vor.u32 %v1229_v0, %v1225_v8  ;;  %v771_v15 = vrot.slane %v3452_v16, 5  ;;  %v2921_v0 = vld [vmem:[%s3357_s5 + $0x54] sm:$0xff] }
  0x90   : > { %2754 = vmatmul.msk.bf16.gmra.mxu0 %vm496_vm3, %v1282_v45  ;;  %v1214_v45 = vshrl.u32 %v2744_v2, 16 }
  0x91   : > { %v1231_v51 = vrot.slane %v1230_v9, 4 }
  0x92   : > { %2646 = vmatmul.msk.bf16.gmra.mxu1 %vm496_vm3, %v2918_v49  ;;  %v761_v49 = vrot.slane %v3381_v35, 5  ;;  %v1216_v52 = vrot.slane %v1214_v45, 4  ;;  %v2928_v45 = vld [vmem:[%s3357_s5 + $0x54] sm:$0xff] }
  0x94   : > { %v763_v60 = vrot.slane %v761_v49, 4  ;;  %v1220_v35 = vor.u32 %v1219_v53, %v1216_v52  ;;  %v762_v6 = vsel %vm3493_vm7, %v2656_v25, %v761_v49  ;;  %v770_v49 = vrot.slane %v768_v31, 4 }
  0x95   : > { %v787_v14 = vunpack.c.l.b16 %v762_v6 }
  0x96   : > { %v1221_v57 = vrot.slane %v1220_v35, 4  ;;  %v772_v25 = vsel %vm3493_vm7, %v770_v49, %v771_v15  ;;  %v2929_v49 = vld [vmem:[%s3357_s5 + $0x60] sm:$0xff] }
  0x97   : > { %v790_v46 = vunpack.c.l.b16 %v772_v25 }
  0x98   : > { %2663 = vmatmul.msk.bf16.gmra.mxu2 %vm496_vm3, %v795_v59  ;;  %v1274_v59 = vunpack.c.l.b16 %v1212_v48  ;;  %v1226_v22 = vsel %vm3385_vm4, %v1221_v57, %v1225_v8  ;;  %v2657_v48 = vrot.slane %v697_v38, 9 }
  0x99   : > { %v1275_v39 = vunpack.c.l.b16 %v1226_v22  ;;  %v1416_v22 = vrot.slane %v3498_v37, 5 }
  0x9a   : > { %v1284_v3 = vpack.c.b16 %v1274_v59, %v1273_v55  ;;  %v2843_v59 = vld [vmem:[%s3357_s5 + $0x18] sm:$0xf]  ;;  %v769_v8 = vsel %vm3493_vm7, %v2657_v48, %v768_v31 }
  0x9b   : > { %v1764_v6 = vshrl.u32 %v2843_v59, 16  ;;  %v789_v9 = vunpack.c.l.b16 %v769_v8 }
  0x9c   : > { %2722 = vmatmul.msk.bf16.gmra.mxu3 %vm496_vm3, %v2926_v7  ;;  %v765_v7 = vsel %vm3493_vm7, %v763_v60, %v764_v61  ;;  %v1257_v60 = vshll.u32 %v3711_v50, 16  ;;  %v3725_v61 = vld [vmem:[%s3357_s5 + $0x1c] sm:$0xf] }
  0x9d   : > { %v788_v17 = vunpack.c.l.b16 %v765_v7  ;;  %v1767_v7 = vshll.u32 %v2843_v59, 16  ;;  %v1773_v57 = vshll.u32 %v3725_v61, 16  ;;  %v1766_v28 = vrot.slane %v1764_v6, 4 }
  0x9e   : > { %v1259_v30 = vrot.slane %v1257_v60, 5  ;;  %v2107_v6 = vrot.slane %v3725_v61, 5 }
  0x9f   : > { %v797_v23 = vpack.c.b16 %v788_v17, %v787_v14  ;;  %v1777_v14 = vshrl.u32 %v3725_v61, 16  ;;  %v1775_v31 = vrot.slane %v1773_v57, 5 }
  0xa0   : > { %2755 = vmatmul.msk.bf16.gmra.mxu0 %vm496_vm3, %v1283_v21  ;;  %v3692_v21 = vld [vmem:[%s3357_s5 + $0x64] sm:$0xf] }
  0xa1   : > { %v1247_v56 = vshll.u32 %v3692_v21, 16  ;;  %v1251_v2 = vshrl.u32 %v3692_v21, 16 }
  0xa2   : > { %2647 = vmatmul.msk.bf16.gmra.mxu1 %vm496_vm3, %v2919_v40  ;;  %v1236_v40 = vsel %vm3385_vm4, %v1231_v51, %v1235_v26 }
  0xa3   : > { %v1276_v19 = vunpack.c.l.b16 %v1236_v40  ;;  %v1249_v12 = vrot.slane %v1247_v56, 5  ;;  %v1253_v20 = vrot.slane %v1251_v2, 4  ;;  %v1769_v56 = vrot.slane %v1767_v7, 5 }
  0xa4   : > { %v798_v40 = vpack.c.b16 %v790_v46, %v789_v9  ;;  %v1779_v2 = vrot.slane %v1777_v14, 4  ;;  %v2846_v46 = vld [vmem:[%s3357_s5 + $0x24] sm:$0xf] }
  0xa5   : > { %v1254_v16 = vor.u32 %v1253_v20, %v1249_v12  ;;  %v1770_v48 = vor.u32 %v1769_v56, %v1766_v28  ;;  %v2760_v28 = vld [vmem:[%s3357_s5 + $0x18] sm:$0xe]  ;;  %v1788_v56 = vshrl.u32 %v2846_v46, 16 }
  0xa6   : > { %v1780_v20 = vor.u32 %v1779_v2, %v1775_v31 }
  0xa7   : > { %v1255_v26 = vrot.slane %v1254_v16, 4  ;;  %v1771_v25 = vrot.slane %v1770_v48, 4 }
  0xa8   : > { %2664 = vmatmul.msk.bf16.gmra.mxu2 %vm496_vm3, %v796_v32  ;;  %v1240_v32 = vrot.slane %v1238_v24, 4  ;;  %v1781_v60 = vrot.slane %v1780_v20, 4 }
  0xa9   : > { %v1260_v37 = vsel %vm3385_vm4, %v1255_v26, %v1259_v30  ;;  %v1420_v30 = vrot.slane %v3529_v4, 5 }
  0xaa   : > { %v1244_v55 = vor.u32 %v1243_v47, %v1240_v32 }
  0xac   : > { %2723 = vmatmul.msk.bf16.gmra.mxu3 %vm496_vm3, %v2927_v54  ;;  %v1285_v54 = vpack.c.b16 %v1276_v19, %v1275_v39  ;;  %v1245_v51 = vrot.slane %v1244_v55, 4 }
  0xad   : > { %v3681_v5 = vpop.f32.mrf.mxu1 }
  0xae   : > { %v1250_v39 = vsel %vm3385_vm4, %v1245_v51, %v1249_v12  ;;  %v1278_v12 = vunpack.c.l.b16 %v1260_v37  ;;  %v1776_v51 = vsel %vm3385_vm4, %v1771_v25, %v1775_v31  ;;  %v1422_v37 = vrot.slane %v1420_v30, 4 }
  0xaf   : > { %v1277_v15 = vunpack.c.l.b16 %v1250_v39  ;;  %v2768_v39 = vrot.slane %v2760_v28, 9 }
  0xb0   : > { %2756 = vmatmul.msk.bf16.gmra.mxu0 %vm496_vm3, %v1284_v3  ;;  %v1413_v3 = vrot.slane %v3488_v27, 5 }
  0xb1   : > { %v1286_v16 = vpack.c.b16 %v1278_v12, %v1277_v15  ;;  %v1790_v12 = vrot.slane %v1788_v56, 4 }
  0xb2   : > { %2648 = vmatmul.msk.bf16.gmra.mxu1 %vm496_vm3, %v2920_v10  ;;  %v2759_v10 = vld [vmem:[%s3357_s5 + $0xc] sm:$0xe]  ;;  %v1415_v24 = vrot.slane %v1413_v3, 4 }
  0xb4   : > { %v1417_v47 = vsel %vm3493_vm7, %v1415_v24, %v1416_v22 }
  0xb5   : > { %v3700_v29 = vpop.f32.mrf.mxu1  ;;  %v1470_v59 = vunpack.c.l.b16 %v1417_v47  ;;  %v1957_v47 = vunpack.c.l.b16 %v1776_v51 }
  0xb7   : > { %v3705_v41 = vpop.f32.mrf.mxu2 }
  0xb8   : > { %2665 = vmatmul.msk.bf16.gmra.mxu2 %vm496_vm3, %v797_v23  ;;  %v2767_v23 = vrot.slane %v2759_v10, 9  ;;  %v3765_v10 = vld [vmem:[%s3357_s5 + $0x28] sm:$0xf] }
  0xb9   : > { %v1797_v2 = vshll.u32 %v3765_v10, 16  ;;  %v1801_v31 = vshrl.u32 %v3765_v10, 16 }
  0xba   : > { %v1414_v32 = vsel %vm3493_vm7, %v2767_v23, %v1413_v3  ;;  %v2876_v3 = vld [vmem:[%s3357_s5 + $0x18] sm:$0xe]  ;;  %v2109_v23 = vrot.slane %v2107_v6, 4 }
  0xbb   : > { %v3713_v52 = vpop.f32.mrf.mxu0  ;;  %v3715_v53 = vpop.f32.mrf.mxu3  ;;  %v1469_v55 = vunpack.c.l.b16 %v1414_v32  ;;  %v2884_v26 = vrot.slane %v2876_v3, 9  ;;  %v2930_v32 = vld [vmem:[%s3357_s5 + $0x18] sm:$0xff] }
  0xbc   : > { %2724 = vmatmul.msk.bf16.gmra.mxu3 %vm496_vm3, %v2928_v45  ;;  %v2845_v45 = vld [vmem:[%s3357_s5 + $0x20] sm:$0x1] }
  0xbd   : > { %v1485_v9 = vpack.c.b16 %v1470_v59, %v1469_v55  ;;  %v2110_v24 = vrot.slane %v2845_v45, 5  ;;  %v1803_v55 = vrot.slane %v1801_v31, 4  ;;  %v3791_v59 = vld [vmem:[%s3357_s5 + $0x2c] sm:$0x1] }
  0xbe   : > { %v1807_v51 = vshll.u32 %v3791_v59, 16 }
  0xbf   : > { %v3728_v35 = vpop.f32.mrf.mxu1  ;;  %v3735_v17 = vpop.f32.mrf.mxu2 }
  0xc0   : > { %2757 = vmatmul.msk.bf16.gmra.mxu0 %vm496_vm3, %v1285_v54  ;;  %v1783_v54 = vshll.u32 %v2845_v45, 16  ;;  %v2108_v45 = vsel %vm3493_vm7, %v2884_v26, %v2107_v6 }
  0xc1   : > { %v2163_v3 = vunpack.c.l.b16 %v2108_v45 }
  0xc2   : > { %2649 = vmatmul.msk.bf16.gmra.mxu1 %vm496_vm3, %v2921_v0  ;;  %v1785_v0 = vrot.slane %v1783_v54, 5  ;;  %v1799_v54 = vrot.slane %v1797_v2, 5 }
  0xc3   : > { %v3739_v27 = vpop.f32.mrf.mxu0  ;;  %v3741_v38 = vpop.f32.mrf.mxu3 }
  0xc4   : > { %v1786_v22 = vsel %vm3385_vm4, %v1781_v60, %v1785_v0 }
  0xc5   : > { %v1958_v48 = vunpack.c.l.b16 %v1786_v22 }
  0xc7   : > { %v3748_v19 = vpop.f32.mrf.mxu1  ;;  %v1973_v0 = vpack.c.b16 %v1958_v48, %v1957_v47 }
  0xc8   : > { %2666 = vmatmul.msk.bf16.gmra.mxu2 %vm496_vm3, %v798_v40  ;;  %v1791_v40 = vshll.u32 %v2846_v46, 16 }
  0xca   : > { %v1793_v20 = vrot.slane %v1791_v40, 5  ;;  %v3806_v40 = vld [vmem:[%s3357_s5 + $0x34] sm:$0xf] }
  0xcb   : > { %v3756_v8 = vpop.f32.mrf.mxu2 }
  0xcc   : > { %2725 = vmatmul.msk.bf16.gmra.mxu3 %vm496_vm3, %v2929_v49  ;;  %v2111_v49 = vsel %vm3493_vm7, %v2109_v23, %v2110_v24  ;;  %v1794_v46 = vor.u32 %v1793_v20, %v1790_v12  ;;  %v2877_v24 = vld [vmem:[%s3357_s5 + $0x24] sm:$0xe]  ;;  %v1427_v12 = vrot.slane %v3563_v62, 5  ;;  %v1821_v20 = vshll.u32 %v3806_v40, 16 }
  0xcd   : > { %v3761_v7 = vpop.f32.mrf.mxu0  ;;  %v2164_v6 = vunpack.c.l.b16 %v2111_v49 }
  0xce   : > { %v1795_v31 = vrot.slane %v1794_v46, 4 }
  0xcf   : > { %v3767_v57 = vpop.f32.mrf.mxu3  ;;  %v650_v14 = vpop.f32.mrf.mxu1  ;;  %v2179_v28 = vpack.c.b16 %v2164_v6, %v2163_v3  ;;  %v2117_v3 = vrot.slane %v3791_v59, 5 }
  0xd0   : > { %2758 = vmatmul.msk.bf16.gmra.mxu0 %vm496_vm3, %v1286_v16  ;;  %v651_v61 = vadd.f32 %v650_v14, %v3713_v52  ;;  %v1423_v52 = vrot.slane %v3548_v11, 5  ;;  %v1421_v16 = vsel %vm3493_vm7, %v2768_v39, %v1420_v30  ;;  %v1804_v14 = vor.u32 %v1803_v55, %v1799_v54  ;;  %v2849_v30 = vld [vmem:[%s3357_s5 + $0x30] sm:$0xf] }
  0xd1   : > { %v1471_v26 = vunpack.c.l.b16 %v1421_v16  ;;  %v1812_v47 = vshrl.u32 %v2849_v30, 16  ;;  %v1815_v48 = vshll.u32 %v2849_v30, 16  ;;  %v1430_v55 = vrot.slane %v3581_v34, 5 }
  0xd2   : > { %2776 = vmatmul.msk.bf16.vlgmr.msra.gmra.mxu1 %vm496_vm3, %v1485_v9  ;;  %v1424_v60 = vsel %vm3493_vm7, %v1422_v37, %v1423_v52  ;;  %v1805_v39 = vrot.slane %v1804_v14, 4  ;;  %v2114_v37 = vrot.slane %v3765_v10, 5  ;;  %v2761_v10 = vld [vmem:[%s3357_s5 + $0x24] sm:$0xe] }
  0xd3   : > { %v3780_v4 = vpop.f32.mrf.mxu2  ;;  %v1472_v22 = vunpack.c.l.b16 %v1424_v60  ;;  %v1800_v60 = vsel %vm3385_vm4, %v1795_v31, %v1799_v54  ;;  %v1814_v6 = vrot.slane %v1812_v47, 4  ;;  %v1817_v46 = vrot.slane %v1815_v48, 5 }
  0xd4   : > { %v2116_v62 = vrot.slane %v2114_v37, 4  ;;  %v1823_v54 = vrot.slane %v1821_v20, 5  ;;  %v1959_v30 = vunpack.c.l.b16 %v1800_v60 }
  0xd5   : > { %v3788_v15 = vpop.f32.mrf.mxu0  ;;  %v1486_v52 = vpack.c.b16 %v1472_v22, %v1471_v26  ;;  %v1429_v26 = vrot.slane %v1427_v12, 4 }
  0xd6   : > { %v2118_v31 = vsel %vm3493_vm7, %v2116_v62, %v2117_v3  ;;  %v2878_v3 = vld [vmem:[%s3357_s5 + $0x30] sm:$0xe] }
  0xd7   : > { %v3793_v25 = vpop.f32.mrf.mxu3  ;;  %v652_v11 = vpop.f32.mrf.mxu1 }
  0xd8   : > { %2835 = vmatmul.msk.bf16.vlgmr.msra.gmra.mxu2 %vm496_vm3, %v2930_v32  ;;  %v653_v9 = vadd.f32 %v652_v11, %v3739_v27  ;;  %v1809_v27 = vrot.slane %v1807_v51, 5  ;;  %v2885_v32 = vrot.slane %v2877_v24, 9  ;;  %v2769_v51 = vrot.slane %v2761_v10, 9  ;;  %v2931_v24 = vld [vmem:[%s3357_s5 + $0x24] sm:$0xff] }
  0xda   : > { %v2115_v34 = vsel %vm3493_vm7, %v2885_v32, %v2114_v37  ;;  %v1431_v32 = vsel %vm3493_vm7, %v1429_v26, %v1430_v55 }
  0xdb   : > { %v835_v23 = vpop.f32.mrf.mxu2 }
  0xdc   : > { %2868 = vmatmul.msk.bf16.vlgmr.msra.gmra.mxu3 %vm496_vm3, %v1973_v0  ;;  %v875_v56 = vadd.f32 %v835_v23, %v651_v61  ;;  %v1825_v61 = vshrl.u32 %v3806_v40, 16  ;;  %v1810_v0 = vsel %vm3385_vm4, %v1805_v39, %v1809_v27  ;;  %v2165_v39 = vunpack.c.l.b16 %v2115_v34 }
  0xdd   : > { %v1323_v2 = vpop.f32.mrf.mxu0  ;;  %v1818_v27 = vor.u32 %v1817_v46, %v1814_v6  ;;  %v2121_v46 = vrot.slane %v3806_v40, 5 }
  0xde   : > { %v1827_v22 = vrot.slane %v1825_v61, 4 }
  0xdf   : > { %v989_v45 = vpop.f32.mrf.mxu3  ;;  %v655_v49 = vpop.f32.mrf.mxu1 }
  0xe0   : > { %2893 = vmatmul.msk.bf16.vlgmr.msra.gmra.mxu0 %vm496_vm3, %v2179_v28  ;;  %v1029_v11 = vadd.f32 %v989_v45, %v875_v56  ;;  %v656_v16 = vadd.f32 %v655_v49, %v3761_v7  ;;  %v1960_v28 = vunpack.c.l.b16 %v1810_v0  ;;  %v3828_v56 = vld [vmem:[%s3357_s5 + $0x38] sm:$0x1]  ;;  %v2166_v49 = vunpack.c.l.b16 %v2118_v31 }
  0xe1   : > { %v1831_v47 = vshll.u32 %v3828_v56, 16 }
  0xe2   : > { %2777 = vmatmul.msk.bf16.gmra.mxu1 %vm496_vm3, %v1486_v52  ;;  %v3824_v7 = vadd.f32 %v1323_v2, %v1029_v11  ;;  %v1428_v52 = vsel %vm3493_vm7, %v2769_v51, %v1427_v12  ;;  %v1974_v45 = vpack.c.b16 %v1960_v28, %v1959_v30  ;;  %v1474_v11 = vunpack.c.l.b16 %v1431_v32  ;;  %v3846_v51 = vld [vmem:[%s3357_s5 + $0x40] sm:$0xf] }
  0xe3   : > { %v837_v14 = vpop.f32.mrf.mxu2  ;;  %v1473_v61 = vunpack.c.l.b16 %v1428_v52  ;;  %v1819_v12 = vrot.slane %v1818_v27, 4  ;;  %v1833_v0 = vrot.slane %v1831_v47, 5  ;;  %v2180_v55 = vpack.c.b16 %v2166_v49, %v2165_v39  ;;  %v2932_v49 = vld [vmem:[%s3357_s5 + $0x30] sm:$0xff] }
  0xe4   : > { %v876_v23 = vadd.f32 %v837_v14, %v653_v9  ;;  %v1828_v9 = vor.u32 %v1827_v22, %v1823_v54  ;;  %v2852_v14 = vld [vmem:[%s3357_s5 + $0x3c] sm:$0xf]  ;;  %v1434_v30 = vrot.slane %v3589_v44, 5  ;;  %v2123_v27 = vrot.slane %v2121_v46, 4 }
  0xe5   : > { %v1325_v59 = vpop.f32.mrf.mxu0  ;;  %v1836_v31 = vshrl.u32 %v2852_v14, 16  ;;  %v1839_v39 = vshll.u32 %v2852_v14, 16  ;;  %v1437_v52 = vrot.slane %v3601_v63, 5 }
  0xe6   : > { %v1829_v60 = vrot.slane %v1828_v9, 4 }
  0xe7   : > { %v991_v37 = vpop.f32.mrf.mxu3  ;;  %v657_v2 = vpop.f32.mrf.mxu1 }
  0xe8   : > { %v1030_v48 = vadd.f32 %v991_v37, %v876_v23  ;;  %2836 = vmatmul.msk.bf16.gmra.mxu2 %vm496_vm3, %v2931_v24  ;;  %v658_v20 = vadd.f32 %v657_v2, %v3788_v15  ;;  %v1487_v15 = vpack.c.b16 %v1474_v11, %v1473_v61  ;;  %v1824_v23 = vsel %vm3385_vm4, %v1819_v12, %v1823_v54 }
  0xe9   : > { %v1834_v24 = vsel %vm3385_vm4, %v1829_v60, %v1833_v0  ;;  %v2124_v37 = vrot.slane %v3828_v56, 5  ;;  %v1845_v54 = vshll.u32 %v3846_v51, 16  ;;  %v1849_v2 = vshrl.u32 %v3846_v51, 16  ;;  %v2854_v0 = vld [vmem:[%s3357_s5 + $0x44] sm:$0x1] }
  0xea   : > { %v3841_v34 = vadd.f32 %v1325_v59, %v1030_v48  ;;  %v2762_v59 = vld [vmem:[%s3357_s5 + $0x30] sm:$0xe]  ;;  %v1962_v9 = vunpack.c.l.b16 %v1834_v24  ;;  %v1436_v48 = vrot.slane %v1434_v30, 4  ;;  %v1838_v61 = vrot.slane %v1836_v31, 4  ;;  %v2879_v31 = vld [vmem:[%s3357_s5 + $0x3c] sm:$0xe] }
  0xeb   : > { %v840_v10 = vpop.f32.mrf.mxu2  ;;  %v2770_v47 = vrot.slane %v2762_v59, 9  ;;  %v1841_v11 = vrot.slane %v1839_v39, 5  ;;  %v2125_v63 = vsel %vm3493_vm7, %v2123_v27, %v2124_v37  ;;  %v1847_v12 = vrot.slane %v1845_v54, 5 }
  0xec   : > { %2869 = vmatmul.msk.bf16.gmra.mxu3 %vm496_vm3, %v1974_v45  ;;  %v877_v62 = vadd.f32 %v840_v10, %v656_v16  ;;  %v2886_v16 = vrot.slane %v2878_v3, 9  ;;  %v1851_v60 = vrot.slane %v1849_v2, 4  ;;  %v1855_v24 = vshll.u32 %v2854_v0, 16  ;;  %v3880_v2 = vld [vmem:[%s3357_s5 + $0x4c] sm:$0xf] }
  0xed   : > { %v1328_v6 = vpop.f32.mrf.mxu0 }
  0xee   : > { %v2122_v56 = vsel %vm3493_vm7, %v2886_v16, %v2121_v46  ;;  %v1438_v46 = vsel %vm3493_vm7, %v1436_v48, %v1437_v52  ;;  %v2128_v16 = vrot.slane %v3846_v51, 5  ;;  %v2131_v48 = vrot.slane %v2854_v0, 5 }
  0xef   : > { %v994_v26 = vpop.f32.mrf.mxu3  ;;  %v660_v22 = vpop.f32.mrf.mxu1  ;;  %v2167_v3 = vunpack.c.l.b16 %v2122_v56  ;;  %v1476_v59 = vunpack.c.l.b16 %v1438_v46 }
  0xf0   : > { %2894 = vmatmul.msk.bf16.gmra.mxu0 %vm496_vm3, %v2180_v55  ;;  %v1031_v28 = vadd.f32 %v994_v26, %v877_v62  ;;  %v661_v40 = vadd.f32 %v660_v22, %v3681_v5  ;;  %v1961_v5 = vunpack.c.l.b16 %v1824_v23  ;;  %v1842_v22 = vor.u32 %v1841_v11, %v1838_v61 }
  0xf1   : > { %v1852_v23 = vor.u32 %v1851_v60, %v1847_v12  ;;  %v2130_v51 = vrot.slane %v2128_v16, 4  ;;  %v1441_v11 = vrot.slane %v3609_v13, 5 }
  0xf2   : > { %2778 = vmatmul.msk.bf16.gmra.mxu1 %vm496_vm3, %v1487_v15  ;;  %v3861_v44 = vadd.f32 %v1328_v6, %v1031_v28  ;;  %v1975_v62 = vpack.c.b16 %v1962_v9, %v1961_v5  ;;  %v2168_v15 = vunpack.c.l.b16 %v2125_v63  ;;  %v1843_v54 = vrot.slane %v1842_v22, 4 }
  0xf3   : > { %v842_v32 = vpop.f32.mrf.mxu2  ;;  %v1857_v5 = vrot.slane %v1855_v24, 5  ;;  %v2887_v9 = vrot.slane %v2879_v31, 9  ;;  %v1873_v63 = vshrl.u32 %v3880_v2, 16  ;;  %v2933_v24 = vld [vmem:[%s3357_s5 + $0x3c] sm:$0xff]  ;;  %v3906_v31 = vld [vmem:[%s3357_s5 + $0x50] sm:$0x1] }
  0xf4   : > { %v878_v45 = vadd.f32 %v842_v32, %v658_v20  ;;  %v1435_v20 = vsel %vm3493_vm7, %v2770_v47, %v1434_v30  ;;  %v2855_v30 = vld [vmem:[%s3357_s5 + $0x48] sm:$0xf]  ;;  %v2181_v27 = vpack.c.b16 %v2168_v15, %v2167_v3  ;;  %v1853_v32 = vrot.slane %v1852_v23, 4 }
  0xf5   : > { %v1330_v10 = vpop.f32.mrf.mxu0  ;;  %v1475_v28 = vunpack.c.l.b16 %v1435_v20  ;;  %v1848_v0 = vsel %vm3385_vm4, %v1843_v54, %v1847_v12  ;;  %v2129_v13 = vsel %vm3493_vm7, %v2887_v9, %v2128_v16  ;;  %v1443_v15 = vrot.slane %v1441_v11, 4 }
  0xf6   : > { %v1858_v3 = vsel %vm3385_vm4, %v1853_v32, %v1857_v5  ;;  %v1875_v22 = vrot.slane %v1873_v63, 4 }
  0xf7   : > { %v996_v55 = vpop.f32.mrf.mxu3  ;;  %v662_v6 = vpop.f32.mrf.mxu1  ;;  %v1488_v47 = vpack.c.b16 %v1476_v59, %v1475_v28  ;;  %v1963_v28 = vunpack.c.l.b16 %v1848_v0  ;;  %v1964_v16 = vunpack.c.l.b16 %v1858_v3  ;;  %v2135_v0 = vrot.slane %v3880_v2, 5 }
  0xf8   : > { %v1032_v14 = vadd.f32 %v996_v55, %v878_v45  ;;  %2837 = vmatmul.msk.bf16.gmra.mxu2 %vm496_vm3, %v2932_v49  ;;  %v663_v26 = vadd.f32 %v662_v6, %v3700_v29  ;;  %v1860_v45 = vshrl.u32 %v2855_v30, 16  ;;  %v1863_v49 = vshll.u32 %v2855_v30, 16  ;;  %v2763_v55 = vld [vmem:[%s3357_s5 + $0x3c] sm:$0xe] }
  0xf9   : > { %v2132_v6 = vsel %vm3493_vm7, %v2130_v51, %v2131_v48  ;;  %v1976_v9 = vpack.c.b16 %v1964_v16, %v1963_v28  ;;  %v2137_v28 = vrot.slane %v2135_v0, 4  ;;  %v2138_v16 = vrot.slane %v3906_v31, 5 }
  0xfa   : > { %v3882_v52 = vadd.f32 %v1330_v10, %v1032_v14  ;;  %v1865_v20 = vrot.slane %v1863_v49, 5  ;;  %v2771_v14 = vrot.slane %v2763_v55, 9  ;;  %v2170_v30 = vunpack.c.l.b16 %v2132_v6  ;;  %v2858_v49 = vld [vmem:[%s3357_s5 + $0x54] sm:$0xf] }
  0xfb   : > { %v845_v39 = vpop.f32.mrf.mxu2  ;;  %v1887_v6 = vshll.u32 %v2858_v49, 16 }
  0xfc   : > { %2870 = vmatmul.msk.bf16.gmra.mxu3 %vm496_vm3, %v1975_v62  ;;  %v879_v37 = vadd.f32 %v845_v39, %v661_v40  ;;  %v1869_v40 = vshll.u32 %v3880_v2, 16  ;;  %v1444_v62 = vrot.slane %v3624_v43, 5  ;;  %v2169_v39 = vunpack.c.l.b16 %v2129_v13 }
  0xfd   : > { %v1333_v29 = vpop.f32.mrf.mxu0  ;;  %v1442_v54 = vsel %vm3493_vm7, %v2771_v14, %v1441_v11  ;;  %v1884_v13 = vshrl.u32 %v2858_v49, 16  ;;  %v1448_v2 = vrot.slane %v3637_v58, 5  ;;  %v1451_v58 = vrot.slane %v3651_v18, 5 }
  0xfe   : > { %v3902_v12 = vrot.slane %v1869_v40, 5  ;;  %v1477_v48 = vunpack.c.l.b16 %v1442_v54  ;;  %v2139_v49 = vsel %vm3493_vm7, %v2137_v28, %v2138_v16  ;;  %v2861_v28 = vld [vmem:[%s3357_s5 + $0x60] sm:$0xf] }
  0xff   : > { %v999_v56 = vpop.f32.mrf.mxu3  ;;  %v665_v61 = vpop.f32.mrf.mxu1 }
 0x100   : > { %2895 = vmatmul.msk.bf16.gmra.mxu0 %vm496_vm3, %v2181_v27  ;;  %v1033_v10 = vadd.f32 %v999_v56, %v879_v37  ;;  %v666_v60 = vadd.f32 %v665_v61, %v3728_v35  ;;  %v1862_v35 = vrot.slane %v1860_v45, 4  ;;  %v3918_v56 = vld [vmem:[%s3357_s5 + $0x58] sm:$0xf]  ;;  %v2182_v61 = vpack.c.b16 %v2170_v30, %v2169_v39 }
 0x101   : > { %v1886_v39 = vrot.slane %v1884_v13, 4  ;;  %v1889_v30 = vrot.slane %v1887_v6, 5 }
 0x102   : > { %2779 = vmatmul.msk.bf16.gmra.mxu1 %vm496_vm3, %v1488_v47  ;;  %v3900_v46 = vadd.f32 %v1333_v29, %v1033_v10  ;;  %v1445_v29 = vsel %vm3493_vm7, %v1443_v15, %v1444_v62  ;;  %v1866_v32 = vor.u32 %v1865_v20, %v1862_v35  ;;  %v1879_v47 = vshll.u32 %v3906_v31, 16  ;;  %v2880_v62 = vld [vmem:[%s3357_s5 + $0x48] sm:$0xe] }
 0x103   : > { %v847_v43 = vpop.f32.mrf.mxu2  ;;  %v1478_v45 = vunpack.c.l.b16 %v1445_v29  ;;  %v1893_v35 = vshll.u32 %v3918_v56, 16  ;;  %v1897_v20 = vshrl.u32 %v3918_v56, 16 }
 0x104   : > { %v880_v23 = vadd.f32 %v847_v43, %v663_v26  ;;  %v1876_v26 = vor.u32 %v1875_v22, %v3902_v12  ;;  %v1867_v40 = vrot.slane %v1866_v32, 4  ;;  %v1881_v55 = vrot.slane %v1879_v47, 5 }
 0x105   : > { %v1335_v59 = vpop.f32.mrf.mxu0  ;;  %v1489_v43 = vpack.c.b16 %v1478_v45, %v1477_v48  ;;  %v2888_v22 = vrot.slane %v2880_v62, 9  ;;  %v1450_v32 = vrot.slane %v1448_v2, 4 }
 0x106   : > { %v1877_v63 = vrot.slane %v1876_v26, 4  ;;  %v3941_v26 = vld [vmem:[%s3357_s5 + $0x5c] sm:$0x1] }
 0x107   : > { %v1001_v27 = vpop.f32.mrf.mxu3  ;;  %v667_v37 = vpop.f32.mrf.mxu1  ;;  %v2136_v45 = vsel %vm3493_vm7, %v2888_v22, %v2135_v0  ;;  %v1903_v18 = vshll.u32 %v3941_v26, 16  ;;  %v2881_v22 = vld [vmem:[%s3357_s5 + $0x54] sm:$0xe] }
 0x108   : > { %v1034_v5 = vadd.f32 %v1001_v27, %v880_v23  ;;  %2838 = vmatmul.msk.bf16.gmra.mxu2 %vm496_vm3, %v2933_v24  ;;  %v668_v51 = vadd.f32 %v667_v37, %v3748_v19  ;;  %v1882_v24 = vsel %vm3385_vm4, %v1877_v63, %v1881_v55  ;;  %v1895_v27 = vrot.slane %v1893_v35, 5 }
 0x109   : > { %v1899_v37 = vrot.slane %v1897_v20, 4  ;;  %v1966_v31 = vunpack.c.l.b16 %v1882_v24  ;;  %v2171_v0 = vunpack.c.l.b16 %v2136_v45  ;;  %v1458_v45 = vrot.slane %v3678_v1, 5 }
 0x10a   : > { %v3923_v3 = vadd.f32 %v1335_v59, %v1034_v5  ;;  %v2764_v59 = vld [vmem:[%s3357_s5 + $0x48] sm:$0xe] }
 0x10b   : > { %v850_v11 = vpop.f32.mrf.mxu2  ;;  %v2772_v29 = vrot.slane %v2764_v59, 9 }
 0x10c   : > { %2871 = vmatmul.msk.bf16.gmra.mxu3 %vm496_vm3, %v1976_v9  ;;  %v881_v10 = vadd.f32 %v850_v11, %v666_v60  ;;  %v1872_v60 = vsel %vm3385_vm4, %v1867_v40, %v3902_v12  ;;  %v2934_v9 = vld [vmem:[%s3357_s5 + $0x48] sm:$0xff]  ;;  %v1900_v11 = vor.u32 %v1899_v37, %v1895_v27  ;;  %v2889_v37 = vrot.slane %v2881_v22, 9 }
 0x10d   : > { %v1338_v19 = vpop.f32.mrf.mxu0  ;;  %v1965_v47 = vunpack.c.l.b16 %v1872_v60 }
 0x10e   : > { %v1901_v6 = vrot.slane %v1900_v11, 4 }
 0x10f   : > { %v1004_v14 = vpop.f32.mrf.mxu3  ;;  %v670_v15 = vpop.f32.mrf.mxu1  ;;  %v1977_v62 = vpack.c.b16 %v1966_v31, %v1965_v47  ;;  %v2145_v47 = vrot.slane %v3941_v26, 5  ;;  %v2765_v31 = vld [vmem:[%s3357_s5 + $0x54] sm:$0xe] }
 0x110   : > { %2896 = vmatmul.msk.bf16.gmra.mxu0 %vm496_vm3, %v2182_v61  ;;  %v1035_v23 = vadd.f32 %v1004_v14, %v881_v10  ;;  %v1890_v61 = vor.u32 %v1889_v30, %v1886_v39  ;;  %v1452_v10 = vsel %vm3493_vm7, %v1450_v32, %v1451_v58  ;;  %v671_v35 = vadd.f32 %v670_v15, %v3705_v41  ;;  %v3962_v39 = vld [vmem:[%s3357_s5 + $0x64] sm:$0xf] }
 0x111   : > { %v1905_v14 = vrot.slane %v1903_v18, 5  ;;  %v1908_v32 = vshrl.u32 %v2861_v28, 16 }
 0x112   : > { %2780 = vmatmul.msk.bf16.gmra.mxu1 %vm496_vm3, %v1489_v43  ;;  %v3937_v12 = vadd.f32 %v1338_v19, %v1035_v23  ;;  %v2172_v19 = vunpack.c.l.b16 %v2139_v49  ;;  %v1891_v13 = vrot.slane %v1890_v61, 4  ;;  %v1480_v43 = vunpack.c.l.b16 %v1452_v10 }
 0x113   : > { %v852_v54 = vpop.f32.mrf.mxu2  ;;  %v1906_v15 = vsel %vm3385_vm4, %v1901_v6, %v1905_v14  ;;  %v1910_v10 = vrot.slane %v1908_v32, 4 }
 0x114   : > { %v882_v5 = vadd.f32 %v852_v54, %v668_v51  ;;  %v1449_v51 = vsel %vm3493_vm7, %v2772_v29, %v1448_v2  ;;  %v2142_v2 = vrot.slane %v3918_v56, 5  ;;  %v2183_v23 = vpack.c.b16 %v2172_v19, %v2171_v0  ;;  %v2935_v0 = vld [vmem:[%s3357_s5 + $0x54] sm:$0xff] }
 0x115   : > { %v1340_v48 = vpop.f32.mrf.mxu0  ;;  %v1479_v20 = vunpack.c.l.b16 %v1449_v51  ;;  %v1896_v41 = vsel %vm3385_vm4, %v1891_v13, %v1895_v27  ;;  %v1455_v29 = vrot.slane %v3663_v42, 5  ;;  %v1917_v27 = vshll.u32 %v3962_v39, 16  ;;  %v2863_v13 = vld [vmem:[%s3357_s5 + $0x68] sm:$0x1] }
 0x116   : > { %v2144_v54 = vrot.slane %v2142_v2, 4  ;;  %v1967_v49 = vunpack.c.l.b16 %v1896_v41  ;;  %v1968_v42 = vunpack.c.l.b16 %v1906_v15  ;;  %v2143_v11 = vsel %vm3493_vm7, %v2889_v37, %v2142_v2 }
 0x117   : > { %v1006_v40 = vpop.f32.mrf.mxu3  ;;  %v672_v63 = vpop.f32.mrf.mxu1  ;;  %v1490_v30 = vpack.c.b16 %v1480_v43, %v1479_v20  ;;  %v1457_v51 = vrot.slane %v1455_v29, 4  ;;  %v2173_v6 = vunpack.c.l.b16 %v2143_v11 }
 0x118   : > { %v1036_v55 = vadd.f32 %v1006_v40, %v882_v5  ;;  %2839 = vmatmul.msk.bf16.gmra.mxu2 %vm496_vm3, %v2934_v9  ;;  %v1911_v5 = vshll.u32 %v2861_v28, 16  ;;  %v673_v61 = vadd.f32 %v672_v63, %v3735_v17  ;;  %v2773_v40 = vrot.slane %v2765_v31, 9 }
 0x119   : > { %v2146_v1 = vsel %vm3493_vm7, %v2144_v54, %v2145_v47  ;;  %v1919_v17 = vrot.slane %v1917_v27, 5  ;;  %v1927_v28 = vshll.u32 %v2863_v13, 16  ;;  %v2149_v31 = vrot.slane %v3962_v39, 5  ;;  %v2864_v27 = vld [vmem:[%s3357_s5 + $0x6c] sm:$0xf] }
 0x11a   : > { %v3959_v16 = vadd.f32 %v1340_v48, %v1036_v55  ;;  %v1921_v48 = vshrl.u32 %v3962_v39, 16  ;;  %v1913_v55 = vrot.slane %v1911_v5, 5  ;;  %v2174_v20 = vunpack.c.l.b16 %v2146_v1  ;;  %v2882_v5 = vld [vmem:[%s3357_s5 + $0x60] sm:$0xe] }
 0x11b   : > { %v855_v60 = vpop.f32.mrf.mxu2  ;;  %v1456_v14 = vsel %vm3493_vm7, %v2773_v40, %v1455_v29  ;;  %v1929_v32 = vrot.slane %v1927_v28, 5  ;;  %v2766_v40 = vld [vmem:[%s3357_s5 + $0x60] sm:$0xe]  ;;  %v1932_v39 = vshrl.u32 %v2864_v27, 16  ;;  %v1465_v1 = vrot.slane %v3711_v50, 5 }
 0x11c   : > { %2872 = vmatmul.msk.bf16.gmra.mxu3 %vm496_vm3, %v1977_v62  ;;  %v883_v24 = vadd.f32 %v855_v60, %v671_v35  ;;  %v1923_v63 = vrot.slane %v1921_v48, 4  ;;  %v1459_v60 = vsel %vm3493_vm7, %v1457_v51, %v1458_v45  ;;  %v1914_v22 = vor.u32 %v1913_v55, %v1910_v10 }
 0x11d   : > { %v1343_v59 = vpop.f32.mrf.mxu0  ;;  %v1482_v41 = vunpack.c.l.b16 %v1459_v60  ;;  %v2184_v15 = vpack.c.b16 %v2174_v20, %v2173_v6  ;;  %v1935_v51 = vshll.u32 %v2864_v27, 16  ;;  %v2151_v10 = vrot.slane %v2149_v31, 4 }
 0x11e   : > { %v2152_v55 = vrot.slane %v2863_v13, 5  ;;  %v2936_v13 = vld [vmem:[%s3357_s5 + $0x60] sm:$0xff] }
 0x11f   : > { %v1009_v56 = vpop.f32.mrf.mxu3  ;;  %v675_v58 = vpop.f32.mrf.mxu1 }
 0x120   : > { %2897 = vmatmul.msk.bf16.gmra.mxu0 %vm496_vm3, %v2183_v23  ;;  %v1037_v9 = vadd.f32 %v1009_v56, %v883_v24  ;;  %v1978_v23 = vpack.c.b16 %v1968_v42, %v1967_v49  ;;  %v1924_v24 = vor.u32 %v1923_v63, %v1919_v17  ;;  %v1915_v56 = vrot.slane %v1914_v22, 4 }
 0x121   : > { %v1462_v42 = vrot.slane %v3692_v21, 5  ;;  %v1934_v22 = vrot.slane %v1932_v39, 4 }
 0x122   : > { %2781 = vmatmul.msk.bf16.gmra.mxu1 %vm496_vm3, %v1490_v30  ;;  %v3979_v18 = vadd.f32 %v1343_v59, %v1037_v9  ;;  %v676_v59 = vadd.f32 %v675_v58, %v3756_v8  ;;  %v1481_v30 = vunpack.c.l.b16 %v1456_v14  ;;  %v1925_v29 = vrot.slane %v1924_v24, 4  ;;  %v3998_v58 = vld [vmem:[%s3357_s5 + $0x70] sm:$0xf]  ;;  %v2866_v24 = vld [vmem:[%s3357_s5 + $0x74] sm:$0x1] }
 0x123   : > { %v857_v26 = vpop.f32.mrf.mxu2  ;;  %v1920_v49 = vsel %vm3385_vm4, %v1915_v56, %v1919_v17  ;;  %v1464_v20 = vrot.slane %v1462_v42, 4  ;;  %v2156_v39 = vrot.slane %v3998_v58, 5 }
 0x124   : > { %v884_v62 = vadd.f32 %v857_v26, %v673_v61  ;;  %v1491_v8 = vpack.c.b16 %v1482_v41, %v1481_v30  ;;  %v2890_v61 = vrot.slane %v2882_v5, 9  ;;  %v1930_v26 = vsel %vm3385_vm4, %v1925_v29, %v1929_v32 }
 0x125   : > { %v1345_v19 = vpop.f32.mrf.mxu0  ;;  %v1970_v6 = vunpack.c.l.b16 %v1930_v26  ;;  %v1951_v5 = vshll.u32 %v2866_v24, 16 }
 0x126   : > { %v2150_v60 = vsel %vm3493_vm7, %v2890_v61, %v2149_v31 }
 0x127   : > { %v1011_v35 = vpop.f32.mrf.mxu3  ;;  %v677_v43 = vpop.f32.mrf.mxu1 }
 0x128   : > { %v1038_v2 = vadd.f32 %v1011_v35, %v884_v62  ;;  %2840 = vmatmul.msk.bf16.gmra.mxu2 %vm496_vm3, %v2935_v0  ;;  %v1941_v62 = vshll.u32 %v3998_v58, 16  ;;  %v1945_v0 = vshrl.u32 %v3998_v58, 16  ;;  %v678_v21 = vadd.f32 %v677_v43, %v3780_v4 }
 0x129   : > { %v2774_v35 = vrot.slane %v2766_v40, 9  ;;  %v2153_v4 = vsel %vm3493_vm7, %v2151_v10, %v2152_v55  ;;  %v1953_v40 = vrot.slane %v1951_v5, 5  ;;  %v2883_v10 = vld [vmem:[%s3357_s5 + $0x6c] sm:$0xe] }
 0x12a   : > { %v3993_v9 = vadd.f32 %v1345_v19, %v1038_v2  ;;  %v1969_v19 = vunpack.c.l.b16 %v1920_v49  ;;  %v1937_v2 = vrot.slane %v1935_v51, 5  ;;  %v1943_v43 = vrot.slane %v1941_v62, 5 }
 0x12b   : > { %v860_v37 = vpop.f32.mrf.mxu2  ;;  %v1463_v41 = vsel %vm3493_vm7, %v2774_v35, %v1462_v42 }
 0x12c   : > { %2873 = vmatmul.msk.bf16.gmra.mxu3 %vm496_vm3, %v1978_v23  ;;  %v885_v54 = vadd.f32 %v860_v37, %v676_v59  ;;  %v1947_v23 = vrot.slane %v1945_v0, 4  ;;  %v2175_v59 = vunpack.c.l.b16 %v2150_v60  ;;  %v1979_v56 = vpack.c.b16 %v1970_v6, %v1969_v19 }
 0x12d   : > { %v1348_v47 = vpop.f32.mrf.mxu0  ;;  %v1938_v29 = vor.u32 %v1937_v2, %v1934_v22  ;;  %v1483_v31 = vunpack.c.l.b16 %v1463_v41 }
 0x12e   : > { %v1948_v32 = vor.u32 %v1947_v23, %v1943_v43 }
 0x12f   : > { %v1014_v48 = vpop.f32.mrf.mxu3  ;;  %v680_v45 = vpop.f32.mrf.mxu1  ;;  %v1939_v42 = vrot.slane %v1938_v29, 4 }
 0x130   : > { %2898 = vmatmul.msk.bf16.gmra.mxu0 %vm496_vm3, %v2184_v15  ;;  %v1039_v11 = vadd.f32 %v1014_v48, %v885_v54  ;;  %v1466_v15 = vsel %vm3493_vm7, %v1464_v20, %v1465_v1  ;;  %v2176_v54 = vunpack.c.l.b16 %v2153_v4  ;;  %v1949_v26 = vrot.slane %v1948_v32, 4  ;;  %v2937_v20 = vld [vmem:[%s3357_s5 + $0x6c] sm:$0xff]  ;;  %s4063_s5 = scalar_lea.vmem [#allocation2], %s2594_s12  ;;  %s2372_s12 = scalar_lea.sflag [#allocation3], %s4059_s14 }
 0x131   : > { %v1484_v27 = vunpack.c.l.b16 %v1466_v15  ;;  %v1944_v62 = vsel %vm3385_vm4, %v1939_v42, %v1943_v43  ;;  %v2891_v1 = vrot.slane %v2883_v10, 9  ;;  %s2396_s18 = sshll.u32 %s4063_s5, 4  ;;  %s4094_s18 = int_to_ptr.vmem [resolvable:$true] %s2396_s18 }
 0x132   : > { %2782 = vmatmul.msk.bf16.gmra.mxu1 %vm496_vm3, %v1491_v8  ;;  %v4012_v17 = vadd.f32 %v1348_v47, %v1039_v11  ;;  %v681_v47 = vadd.f32 %v680_v45, %v3715_v53  ;;  %v2185_v49 = vpack.c.b16 %v2176_v54, %v2175_v59  ;;  %v1954_v0 = vsel %vm3385_vm4, %v1949_v26, %v1953_v40 }
 0x133   : > { %v862_v63 = vpop.f32.mrf.mxu2  ;;  %v1492_v51 = vpack.c.b16 %v1484_v27, %v1483_v31  ;;  %v2157_v22 = vsel %vm3493_vm7, %v2891_v1, %v2156_v39 }
 0x134   : > { %v886_v14 = vadd.f32 %v862_v63, %v678_v21  ;;  %v2158_v21 = vrot.slane %v2156_v39, 4  ;;  %v2159_v63 = vrot.slane %v2866_v24, 5  ;;  %v2177_v43 = vunpack.c.l.b16 %v2157_v22 }
 0x135   : > { %v1350_v50 = vpop.f32.mrf.mxu0 }
 0x136   : > { %v2160_v36 = vsel %vm3493_vm7, %v2158_v21, %v2159_v63 }
 0x137   : > { %v1016_v28 = vpop.f32.mrf.mxu3  ;;  %v682_v30 = vpop.f32.mrf.mxu1  ;;  %v2178_v23 = vunpack.c.l.b16 %v2160_v36 }
 0x138   : > { %v1040_v37 = vadd.f32 %v1016_v28, %v886_v14  ;;  %2841 = vmatmul.msk.bf16.gmra.mxu2 %vm496_vm3, %v2936_v13  ;;  %v683_v19 = vadd.f32 %v682_v30, %v3741_v38  ;;  %v1971_v14 = vunpack.c.l.b16 %v1944_v62  ;;  %v1972_v13 = vunpack.c.l.b16 %v1954_v0 }
 0x139   : > { %v2186_v30 = vpack.c.b16 %v2178_v23, %v2177_v43 }
 0x13a   : > { %v4026_v8 = vadd.f32 %v1350_v50, %v1040_v37  ;;  %v1980_v38 = vpack.c.b16 %v1972_v13, %v1971_v14 }
 0x13b   : > { %v865_v48 = vpop.f32.mrf.mxu2 }
 0x13c   : > { %2874 = vmatmul.msk.bf16.gmra.mxu3 %vm496_vm3, %v1979_v56  ;;  %v887_v61 = vadd.f32 %v865_v48, %v681_v47 }
 0x13d   : > { %v1353_v11 = vpop.f32.mrf.mxu0 }
 0x13f   : > { %v1019_v55 = vpop.f32.mrf.mxu3  ;;  %v685_v53 = vpop.f32.mrf.mxu1 }
 0x140   : > { %2899 = vmatmul.msk.bf16.gmra.mxu0 %vm496_vm3, %v2185_v49  ;;  %v1041_v45 = vadd.f32 %v1019_v55, %v887_v61  ;;  %v686_v24 = vadd.f32 %v685_v53, %v3767_v57 }
 0x142   : > { %2783 = vmatmul.msk.bf16.gmra.mxu1 %vm496_vm3, %v1492_v51  ;;  %v4038_v58 = vadd.f32 %v1353_v11, %v1041_v45 }
 0x143   : > { %v867_v6 = vpop.f32.mrf.mxu2 }
 0x144   : > { %v888_v35 = vadd.f32 %v867_v6, %v683_v19 }
 0x145   : > { %v1355_v60 = vpop.f32.mrf.mxu0 }
 0x147   : > { %v1021_v2 = vpop.f32.mrf.mxu3  ;;  %v687_v50 = vpop.f32.mrf.mxu1 }
 0x148   : > { %v1042_v4 = vadd.f32 %v1021_v2, %v888_v35  ;;  %2842 = vmatmul.msk.bf16.gmra.mxu2 %vm496_vm3, %v2937_v20  ;;  %v688_v54 = vadd.f32 %v687_v50, %v3793_v25 }
 0x14a   : > { %v4047_v28 = vadd.f32 %v1355_v60, %v1042_v4 }
 0x14b   : > { %v870_v59 = vpop.f32.mrf.mxu2 }
 0x14c   : > { %2875 = vmatmul.msk.bf16.gmra.mxu3 %vm496_vm3, %v1980_v38  ;;  %v889_v41 = vadd.f32 %v870_v59, %v686_v24 }
 0x14d   : > { %v1358_v15 = vpop.f32.mrf.mxu0 }
 0x14f   : > { %v1024_v33 = vpop.f32.mrf.mxu3  ;;  %v1529_v37 = vpop.f32.mrf.mxu1 }
 0x150   : > { %2900 = vmatmul.msk.bf16.gmra.mxu0 %vm496_vm3, %v2186_v30  ;;  %v1043_v56 = vadd.f32 %v1024_v33, %v889_v41  ;;  %v1569_v61 = vadd.f32 %v1529_v37, %v3824_v7 }
 0x152   : > { %v4052_v29 = vadd.f32 %v1358_v15, %v1043_v56 }
 0x153   : > { %v872_v32 = vpop.f32.mrf.mxu2 }
 0x154   : > { %v890_v5 = vadd.f32 %v872_v32, %v688_v54 }
 0x155   : > { %v1360_v57 = vpop.f32.mrf.mxu0 }
 0x157   : > { %v1026_v47 = vpop.f32.mrf.mxu3  ;;  %v1531_v31 = vpop.f32.mrf.mxu1 }
 0x158   : > { %v1044_v27 = vadd.f32 %v1026_v47, %v890_v5  ;;  %v1570_v25 = vadd.f32 %v1531_v31, %v3841_v34 }
 0x15a   : > { %v4054_v48 = vadd.f32 %v1360_v57, %v1044_v27 }
 0x15b   : > { %v1683_v49 = vpop.f32.mrf.mxu2 }
 0x15c   : > { %v1723_v11 = vadd.f32 %v1683_v49, %v1569_v61 }
 0x15d   : > { %v2223_v42 = vpop.f32.mrf.mxu0 }
 0x15f   : > { %v2017_v26 = vpop.f32.mrf.mxu3  ;;  %v1534_v40 = vpop.f32.mrf.mxu1 }
 0x160   : > { %v2057_v39 = vadd.f32 %v2017_v26, %v1723_v11  ;;  %v1571_v7 = vadd.f32 %v1534_v40, %v3861_v44 }
 0x162   : > { %v2263_v53 = vadd.f32 %v2223_v42, %v2057_v39 }
 0x163   : > { %v1685_v51 = vpop.f32.mrf.mxu2 }
 0x164   : > { %v1724_v10 = vadd.f32 %v1685_v51, %v1570_v25  ;;  %v2332_v21 = vmul.f32 %v2263_v53, %v2263_v53 }
 0x165   : > { %v2225_v55 = vpop.f32.mrf.mxu0 }
 0x167   : > { %v2019_v45 = vpop.f32.mrf.mxu3  ;;  %v1536_v62 = vpop.f32.mrf.mxu1 }
 0x168   : > { %v2058_v0 = vadd.f32 %v2019_v45, %v1724_v10  ;;  %v1572_v2 = vadd.f32 %v1536_v62, %v3882_v52 }
 0x16a   : > { %v2264_v1 = vadd.f32 %v2225_v55, %v2058_v0 }
 0x16b   : > { %v1688_v63 = vpop.f32.mrf.mxu2 }
 0x16c   : > { %v2942_v19 = vpack.c.bf16 %v2264_v1, %v2263_v53  ;;  %v2311_v6 = vadd.f32 %v2264_v1, %v2263_v53  ;;  %v2333_v34 = vmul.f32 %v2264_v1, %v2264_v1  ;;  %v1725_v35 = vadd.f32 %v1688_v63, %v1571_v7 }
 0x16d   : > { %v2228_v20 = vpop.f32.mrf.mxu0 }
 0x16e   : > { %v2348_v14 = vadd.f32 %v2333_v34, %v2332_v21  ;;  %2943 = vst [vmem:[%s4063_s5] sm:$0xff] %v2942_v19  }
 0x16f   : > { %v2022_v13 = vpop.f32.mrf.mxu3  ;;  %v1539_v60 = vpop.f32.mrf.mxu1 }
 0x170   : > { %v2059_v22 = vadd.f32 %v2022_v13, %v1725_v35  ;;  %v1573_v15 = vadd.f32 %v1539_v60, %v3900_v46 }
 0x172   : > { %v2265_v36 = vadd.f32 %v2228_v20, %v2059_v22 }
 0x173   : > { %v1690_v50 = vpop.f32.mrf.mxu2 }
 0x174   : > { %v2312_v44 = vadd.f32 %v2311_v6, %v2265_v36  ;;  %v2334_v4 = vmul.f32 %v2265_v36, %v2265_v36  ;;  %v1726_v38 = vadd.f32 %v1690_v50, %v1572_v2 }
 0x175   : > { %v2230_v43 = vpop.f32.mrf.mxu0 }
 0x176   : > { %v2349_v23 = vadd.f32 %v2348_v14, %v2334_v4 }
 0x177   : > { %v2024_v24 = vpop.f32.mrf.mxu3  ;;  %v1541_v59 = vpop.f32.mrf.mxu1 }
 0x178   : > { %v2060_v30 = vadd.f32 %v2024_v24, %v1726_v38  ;;  %v1574_v49 = vadd.f32 %v1541_v59, %v3923_v3 }
 0x17a   : > { %v2266_v41 = vadd.f32 %v2230_v43, %v2060_v30 }
 0x17b   : > { %v1693_v33 = vpop.f32.mrf.mxu2 }
 0x17c   : > { %v2947_v37 = vpack.c.bf16 %v2266_v41, %v2265_v36  ;;  %v2313_v56 = vadd.f32 %v2312_v44, %v2266_v41  ;;  %v2335_v54 = vmul.f32 %v2266_v41, %v2266_v41  ;;  %v1727_v32 = vadd.f32 %v1693_v33, %v1573_v15 }
 0x17d   : > { %v2233_v5 = vpop.f32.mrf.mxu0 }
 0x17e   : > { %v2350_v52 = vadd.f32 %v2349_v23, %v2335_v54  ;;  %2979 = vst [vmem:[%s4063_s5 + $0x8] sm:$0xff] %v2947_v37  }
 0x17f   : > { %v2027_v57 = vpop.f32.mrf.mxu3  ;;  %v1544_v47 = vpop.f32.mrf.mxu1 }
 0x180   : > { %v2061_v31 = vadd.f32 %v2027_v57, %v1727_v32  ;;  %v1575_v55 = vadd.f32 %v1544_v47, %v3937_v12 }
 0x182   : > { %v2267_v27 = vadd.f32 %v2233_v5, %v2061_v31 }
 0x183   : > { %v1695_v61 = vpop.f32.mrf.mxu2 }
 0x184   : > { %v2314_v42 = vadd.f32 %v2313_v56, %v2267_v27  ;;  %v2336_v11 = vmul.f32 %v2267_v27, %v2267_v27  ;;  %v1728_v26 = vadd.f32 %v1695_v61, %v1574_v49 }
 0x185   : > { %v2235_v46 = vpop.f32.mrf.mxu0 }
 0x186   : > { %v2351_v40 = vadd.f32 %v2350_v52, %v2336_v11 }
 0x187   : > { %v2029_v25 = vpop.f32.mrf.mxu3  ;;  %v1546_v39 = vpop.f32.mrf.mxu1 }
 0x188   : > { %v2062_v51 = vadd.f32 %v2029_v25, %v1728_v26  ;;  %v1576_v34 = vadd.f32 %v1546_v39, %v3959_v16 }
 0x18a   : > { %v2268_v10 = vadd.f32 %v2235_v46, %v2062_v51 }
 0x18b   : > { %v1698_v53 = vpop.f32.mrf.mxu2 }
 0x18c   : > { %v2952_v45 = vpack.c.bf16 %v2268_v10, %v2267_v27  ;;  %v2315_v62 = vadd.f32 %v2314_v42, %v2268_v10  ;;  %v2337_v0 = vmul.f32 %v2268_v10, %v2268_v10  ;;  %v1729_v1 = vadd.f32 %v1698_v53, %v1575_v55 }
 0x18d   : > { %v2238_v7 = vpop.f32.mrf.mxu0 }
 0x18e   : > { %v2352_v3 = vadd.f32 %v2351_v40, %v2337_v0  ;;  %2980 = vst [vmem:[%s4063_s5 + $0x10] sm:$0xff] %v2952_v45  }
 0x18f   : > { %v2032_v21 = vpop.f32.mrf.mxu3  ;;  %v1549_v63 = vpop.f32.mrf.mxu1 }
 0x190   : > { %v2063_v19 = vadd.f32 %v2032_v21, %v1729_v1  ;;  %v1577_v44 = vadd.f32 %v1549_v63, %v3979_v18 }
 0x192   : > { %v2269_v6 = vadd.f32 %v2238_v7, %v2063_v19 }
 0x193   : > { %v1700_v35 = vpop.f32.mrf.mxu2 }
 0x194   : > { %v2316_v20 = vadd.f32 %v2315_v62, %v2269_v6  ;;  %v2338_v14 = vmul.f32 %v2269_v6, %v2269_v6  ;;  %v1730_v13 = vadd.f32 %v1700_v35, %v1576_v34 }
 0x195   : > { %v2240_v12 = vpop.f32.mrf.mxu0 }
 0x196   : > { %v2353_v60 = vadd.f32 %v2352_v3, %v2338_v14 }
 0x197   : > { %v2034_v22 = vpop.f32.mrf.mxu3  ;;  %v1551_v36 = vpop.f32.mrf.mxu1 }
 0x198   : > { %v2064_v2 = vadd.f32 %v2034_v22, %v1730_v13  ;;  %v1578_v37 = vadd.f32 %v1551_v36, %v3993_v9 }
 0x19a   : > { %v2270_v50 = vadd.f32 %v2240_v12, %v2064_v2 }
 0x19b   : > { %v1703_v4 = vpop.f32.mrf.mxu2 }
 0x19c   : > { %v2957_v38 = vpack.c.bf16 %v2270_v50, %v2269_v6  ;;  %v2317_v43 = vadd.f32 %v2316_v20, %v2270_v50  ;;  %v2339_v23 = vmul.f32 %v2270_v50, %v2270_v50  ;;  %v1731_v24 = vadd.f32 %v1703_v4, %v1577_v44 }
 0x19d   : > { %v2243_v59 = vpop.f32.mrf.mxu0 }
 0x19e   : > { %v2354_v16 = vadd.f32 %v2353_v60, %v2339_v23  ;;  %2981 = vst [vmem:[%s4063_s5 + $0x18] sm:$0xff] %v2957_v38  }
 0x19f   : > { %v2037_v30 = vpop.f32.mrf.mxu3  ;;  %v1554_v41 = vpop.f32.mrf.mxu1 }
 0x1a0   : > { %v2065_v15 = vadd.f32 %v2037_v30, %v1731_v24  ;;  %v1579_v49 = vadd.f32 %v1554_v41, %v4012_v17 }
 0x1a2   : > { %v2271_v33 = vadd.f32 %v2243_v59, %v2065_v15 }
 0x1a3   : > { %v1705_v56 = vpop.f32.mrf.mxu2 }
 0x1a4   : > { %v2318_v54 = vadd.f32 %v2317_v43, %v2271_v33  ;;  %v2340_v32 = vmul.f32 %v2271_v33, %v2271_v33  ;;  %v1732_v5 = vadd.f32 %v1705_v56, %v1578_v37 }
 0x1a5   : > { %v2245_v18 = vpop.f32.mrf.mxu0 }
 0x1a6   : > { %v2355_v52 = vadd.f32 %v2354_v16, %v2340_v32 }
 0x1a7   : > { %v2039_v57 = vpop.f32.mrf.mxu3  ;;  %v1556_v47 = vpop.f32.mrf.mxu1 }
 0x1a8   : > { %v2066_v31 = vadd.f32 %v2039_v57, %v1732_v5  ;;  %v1580_v55 = vadd.f32 %v1556_v47, %v4026_v8 }
 0x1aa   : > { %v2272_v27 = vadd.f32 %v2245_v18, %v2066_v31 }
 0x1ab   : > { %v1708_v61 = vpop.f32.mrf.mxu2 }
 0x1ac   : > { %v2962_v42 = vpack.c.bf16 %v2272_v27, %v2271_v33  ;;  %v2319_v11 = vadd.f32 %v2318_v54, %v2272_v27  ;;  %v2341_v26 = vmul.f32 %v2272_v27, %v2272_v27  ;;  %v1733_v46 = vadd.f32 %v1708_v61, %v1579_v49 }
 0x1ad   : > { %v2248_v40 = vpop.f32.mrf.mxu0 }
 0x1ae   : > { %v2356_v9 = vadd.f32 %v2355_v52, %v2341_v26  ;;  %2982 = vst [vmem:[%s4063_s5 + $0x20] sm:$0xff] %v2962_v42  }
 0x1af   : > { %v2042_v25 = vpop.f32.mrf.mxu3  ;;  %v1559_v51 = vpop.f32.mrf.mxu1 }
 0x1b0   : > { %v2067_v39 = vadd.f32 %v2042_v25, %v1733_v46  ;;  %v1581_v63 = vadd.f32 %v1559_v51, %v4038_v58 }
 0x1b2   : > { %v2273_v10 = vadd.f32 %v2248_v40, %v2067_v39 }
 0x1b3   : > { %v1710_v53 = vpop.f32.mrf.mxu2 }
 0x1b4   : > { %v2320_v45 = vadd.f32 %v2319_v11, %v2273_v10  ;;  %v2342_v62 = vmul.f32 %v2273_v10, %v2273_v10  ;;  %v1734_v0 = vadd.f32 %v1710_v53, %v1580_v55 }
 0x1b5   : > { %v2250_v17 = vpop.f32.mrf.mxu0 }
 0x1b6   : > { %v2357_v1 = vadd.f32 %v2356_v9, %v2342_v62 }
 0x1b7   : > { %v2044_v7 = vpop.f32.mrf.mxu3  ;;  %v1561_v19 = vpop.f32.mrf.mxu1 }
 0x1b8   : > { %v2068_v3 = vadd.f32 %v2044_v7, %v1734_v0  ;;  %v1582_v36 = vadd.f32 %v1561_v19, %v4047_v28 }
 0x1ba   : > { %v2274_v21 = vadd.f32 %v2250_v17, %v2068_v3 }
 0x1bb   : > { %v1713_v6 = vpop.f32.mrf.mxu2 }
 0x1bc   : > { %v2967_v34 = vpack.c.bf16 %v2274_v21, %v2273_v10  ;;  %v2321_v35 = vadd.f32 %v2320_v45, %v2274_v21  ;;  %v2343_v20 = vmul.f32 %v2274_v21, %v2274_v21  ;;  %v1735_v14 = vadd.f32 %v1713_v6, %v1581_v63 }
 0x1bd   : > { %v2253_v13 = vpop.f32.mrf.mxu0 }
 0x1be   : > { %v2358_v8 = vadd.f32 %v2357_v1, %v2343_v20  ;;  %2983 = vst [vmem:[%s4063_s5 + $0x28] sm:$0xff] %v2967_v34  }
 0x1bf   : > { %v2047_v12 = vpop.f32.mrf.mxu3  ;;  %v1564_v58 = vpop.f32.mrf.mxu1 }
 0x1c0   : > { %v2069_v60 = vadd.f32 %v2047_v12, %v1735_v14  ;;  %v1583_v16 = vadd.f32 %v1564_v58, %v4052_v29 }
 0x1c2   : > { %v2275_v22 = vadd.f32 %v2253_v13, %v2069_v60 }
 0x1c3   : > { %v1715_v2 = vpop.f32.mrf.mxu2 }
 0x1c4   : > { %v2322_v50 = vadd.f32 %v2321_v35, %v2275_v22  ;;  %v2344_v44 = vmul.f32 %v2275_v22, %v2275_v22  ;;  %v1736_v4 = vadd.f32 %v1715_v2, %v1582_v36 }
 0x1c5   : > { %v2255_v38 = vpop.f32.mrf.mxu0 }
 0x1c6   : > { %v2359_v43 = vadd.f32 %v2358_v8, %v2344_v44 }
 0x1c7   : > { %v2049_v23 = vpop.f32.mrf.mxu3  ;;  %v1566_v56 = vpop.f32.mrf.mxu1 }
 0x1c8   : > { %v2070_v24 = vadd.f32 %v2049_v23, %v1736_v4  ;;  %v1584_v52 = vadd.f32 %v1566_v56, %v4054_v48 }
 0x1ca   : > { %v2276_v59 = vadd.f32 %v2255_v38, %v2070_v24 }
 0x1cb   : > { %v1718_v30 = vpop.f32.mrf.mxu2 }
 0x1cc   : > { %v2972_v41 = vpack.c.bf16 %v2276_v59, %v2275_v22  ;;  %v2323_v15 = vadd.f32 %v2322_v50, %v2276_v59  ;;  %v2345_v33 = vmul.f32 %v2276_v59, %v2276_v59  ;;  %v1737_v28 = vadd.f32 %v1718_v30, %v1583_v16 }
 0x1cd   : > { %v2258_v54 = vpop.f32.mrf.mxu0 }
 0x1ce   : > { %v2360_v37 = vadd.f32 %v2359_v43, %v2345_v33  ;;  %2984 = vst [vmem:[%s4063_s5 + $0x30] sm:$0xff] %v2972_v41  }
 0x1cf   : > { %v2052_v32 = vpop.f32.mrf.mxu3 }
 0x1d0   : > { %v2071_v5 = vadd.f32 %v2052_v32, %v1737_v28 }
 0x1d2   : > { %v2277_v18 = vadd.f32 %v2258_v54, %v2071_v5 }
 0x1d3   : > { %v1720_v29 = vpop.f32.mrf.mxu2 }
 0x1d4   : > { %v2324_v57 = vadd.f32 %v2323_v15, %v2277_v18  ;;  %v2346_v47 = vmul.f32 %v2277_v18, %v2277_v18  ;;  %v1738_v31 = vadd.f32 %v1720_v29, %v1584_v52 }
 0x1d5   : > { %v2260_v42 = vpop.f32.mrf.mxu0 }
 0x1d6   : > { %v2361_v27 = vadd.f32 %v2360_v37, %v2346_v47 }
 0x1d7   : > { %v2054_v49 = vpop.f32.mrf.mxu3 }
 0x1d8   : > { %v2072_v61 = vadd.f32 %v2054_v49, %v1738_v31 }
 0x1da   : > { %v2278_v48 = vadd.f32 %v2260_v42, %v2072_v61 }
 0x1dc   : > { %v2977_v11 = vpack.c.bf16 %v2278_v48, %v2277_v18  ;;  %v2325_v26 = vadd.f32 %v2324_v57, %v2278_v48  ;;  %v2347_v46 = vmul.f32 %v2278_v48, %v2278_v48 }
 0x1de   : > { %v2326_v40 = vrot.slane %v2325_v26, 4  ;;  %v2362_v9 = vadd.f32 %v2361_v27, %v2347_v46  ;;  %2985 = vst [vmem:[%s4063_s5 + $0x38] sm:$0xff] %v2977_v11  }
 0x1df   : > { %3100 = shalt.err (!%p3097_p6)
}
 0x1e0   : > { %s3229_s5 = smov 64   ;;  %s3230_s28 = smov 4   ;;  %v2327_v25 = vadd.f32 %v2326_v40, %v2325_v26  ;;  %v2363_v39 = vrot.slane %v2362_v9, 4 }
 0x1e1   : > { %2990 = dma.vmem_to_hbm [thread:$0]  (%p3311_p5), %s4094_s18, 1024, %s2399_s10, %s2372_s12, %s3229_s5, %s3229_s5, %s3230_s28  }
 0x1e2   : > { %v2364_v51 = vadd.f32 %v2363_v39, %v2362_v9  ;;  %v2328_v10 = vrot.slane %v2327_v25, 2  ;;  %s2413_s27 = scalar_lea.hbm %s4186_s3, %s2908_s13  ;;  %s4200_s26 = sadd.s32 4294967295, %s3227_s22  }
 0x1e3   : > { %s4116_s6 = sand.u32 1, %s4200_s26   ;;  %s2429_s11 = scalar_lea.hbm %s4187_s4, %s2908_s13 }
 0x1e4   : > { %v2329_v55 = vadd.f32 %v2328_v10, %v2327_v25  ;;  %v2365_v53 = vrot.slane %v2364_v51, 2  ;;  %s4201_s0 = sshll.u32 %s4059_s14, 3  ;;  %s2417_s10 = sshll.u32 %s2413_s27, 4  ;;  %s2418_s10 = int_to_ptr.hbm [resolvable:$true] %s2417_s10 }
 0x1e5   : > { %s225_s1 = scalar_lea.vmem [#allocation4], %s4201_s0  ;;  %s4202_s12 = smov %s4201_s0 }
 0x1e6   : > { %s2415_s18 = sshll.u32 %s225_s1, 4  ;;  %v2330_v45 = vrot.slane %v2329_v55, 1  ;;  %v2366_v62 = vadd.f32 %v2365_v53, %v2364_v51  ;;  %s232_s5 = scalar_lea.vmem [#allocation6], %s4202_s12  ;;  %s2416_s18 = int_to_ptr.vmem [resolvable:$true] %s2415_s18 }
 0x1e7   : > { %s2431_s28 = sshll.u32 %s232_s5, 4  ;;  %s2433_s7 = sshll.u32 %s2429_s11, 4  ;;  %s4125_s28 = int_to_ptr.vmem [resolvable:$true] %s2431_s28  ;;  %s4127_s7 = int_to_ptr.hbm [resolvable:$true] %s2433_s7 }
 0x1e8   : > { %v2331_v0 = vadd.f32 %v2330_v45, %v2329_v55  ;;  %v2367_v17 = vrot.slane %v2366_v62, 1  ;;  %s2377_s0 = scalar_lea.sflag [#allocation5], %s4116_s6  ;;  %s3115_s13 = sshra.s32 %s2418_s10, 4  ;;  %s3116_s13 = int_to_ptr.hbm [resolvable:$true] %s3115_s13 }
 0x1e9   : > { %s3117_s23 = scalar_lea.hbm %s3116_s13, 8  ;;  %s3121_s27 = scalar_lea.hbm %s4186_s3, 32 }
 0x1ea   : > { %2369 = vst [vmem:[%s225_s1] sm:$0xff] %v2331_v0  ;;  %v2368_v1 = vadd.f32 %v2367_v17, %v2366_v62  ;;  %p3118_p8 = scmp.ne.s32.totalorder %s3116_s13, %s3117_s23  ;;  %p3122_p11 = scmp.lt.s32.totalorder %s3116_s13, %s4186_s3 }
 0x1eb   : > { %p3123_p12 = scmp.lt.s32.totalorder %s3121_s27, %s3117_s23 }
 0x1ec   : > { %p3119_p9 = pnand %p3118_p8, %p3311_p5 }
 0x1ed   : > { %p3124_p13 = por %p3123_p12, %p3122_p11 }
 0x1ee   : > { %p3120_p10 = pneg %p3119_p9 }
 0x1f0   : > { %p3125_p0 = pnand %p3124_p13, %p3120_p10 }
 0x1f2   : > { %3128 = shalt.err (!%p3125_p0)
}
 0x1f3   : > { %2991 = dma.vmem_to_hbm [thread:$0]  (%p3311_p5), %s2416_s18, 128, %s2418_s10, %s2377_s0   ;;  %2370 = vst [vmem:[%s232_s5] sm:$0xff] %v2368_v1 }
 0x1f4   : > { %s3143_s1 = sshra.s32 %s4127_s7, 4  ;;  %s3149_s13 = scalar_lea.hbm %s4187_s4, 32  ;;  %s3144_s1 = int_to_ptr.hbm [resolvable:$true] %s3143_s1 }
 0x1f5   : > { %s3145_s6 = scalar_lea.hbm %s3144_s1, 8  ;;  %p3150_p4 = scmp.lt.s32.totalorder %s3144_s1, %s4187_s4 }
 0x1f6   : > { %p3146_p1 = scmp.ne.s32.totalorder %s3144_s1, %s3145_s6  ;;  %p3151_p6 = scmp.lt.s32.totalorder %s3149_s13, %s3145_s6 }
 0x1f8   : > { %p3147_p2 = pnand %p3146_p1, %p3311_p5  ;;  %p3152_p8 = por %p3151_p6, %p3150_p4 }
 0x1fa   : > { %p3148_p3 = pneg %p3147_p2 }
 0x1fc   : > { %p3153_p9 = pnand %p3152_p8, %p3148_p3 }
 0x1fe   : > { %3156 = shalt.err (!%p3153_p9)
}
 0x1ff   : > { %2992 = dma.vmem_to_hbm [thread:$0]  (%p3311_p5), %s4125_s28, 128, %s4127_s7, %s2377_s0  }
 0x200 PF: > { %p3006_p10 = scmp.ge.s32.totalorder %s3227_s22, 2  ;;  %s2445_s18 = sand.u32 1, %s3199_s15  }
 0x201   : > { %s2446_s10 = scalar_lea.sflag [#allocation3], %s2445_s18 }
 0x202   : > { %p2997_p11 = pnand %p3006_p10, %p3319_p7 }
 0x204   : > { %p2998_p12 = pneg %p2997_p11 }
 0x206   : > { %3190 = dma.done.wait (%p2998_p12), %s2446_s10, 1024  }
 0x207   : > { %3192 = vsyncadd (%p2998_p12), %s2446_s10, 4294966272  ;;  %s4203_s5 = sadd.s32 4294967294, %s3227_s22  }
 0x208   : > { %s2455_s11 = sand.u32 1, %s4203_s5  }
 0x209   : > { %s2456_s27 = scalar_lea.sflag [#allocation5], %s2455_s11 }
 0x20a   : > { %3194 = dma.done.wait (%p2998_p12), %s2456_s27, 256  }
 0x20b   : > { %3196 = vsyncadd (%p2998_p12), %s2456_s27, 4294967040  ;;  %s21_s22 = sadd.s32 1, %s3227_s22   ;;  %s4204_s15 = smov %s3203_s16 }
 0x20c   : > { %p18_p5 = scmp.ge.s32.totalorder %s21_s22, 6   ;;  %s4205_s16 = smov %s3207_s17 }
 0x20d   : > { %s4206_s17 = smov %s3329_s9  ;;  %s4207_s18 = smov %s3219_s20 }
 0x20e   : > { %s4208_s19 = smov %s3223_s21  ;;  %s4209_s20 = smov %s4212_s24 }
 0x20f   : > { %s4210_s21 = smov %s4216_s25  ;;  %20 = sbr.rel (!%p18_p5) target bundleno = 10 (0xa), region = 106 }
 0x214   :  { %2472 = vsyncpa [#allocation3], 1 }
 0x215   :  { %2474 = vsyncpa [#allocation3 + $0x1], 1 }
 0x216   :  { %2475 = vsyncpa [#allocation5], 1 }
 0x217   :  { %2477 = vsyncpa [#allocation5 + $0x1], 1 }

</bundles_post_ra>
